<compile_context>
chip_gen: v7x
topology: tpu7x:2x2x1
jax: 0.10.0
libtpu: 0.0.40
codegen_flags: <defaults>
</compile_context>

<pallas_src>
import functools

import jax
import jax.numpy as jnp
from jax import lax
from jax.experimental import pallas as pl
from jax.experimental.pallas import tpu as pltpu


# --------------------------- fused LSTM0 kernel -----------------------------
def _lstm0_fused_kernel(*args, seq, batch, hidden, num_layer):
    # ---- unpack refs: inputs..., output, scratch ---------------------------
    x_ref = args[0]                          # (seq*batch, feat)
    wih0_ref, b0_ref, whh0_ref = args[1], args[2], args[3]
    pos = 4
    deep = []                                # layers 1..num_layer-1: (wih, b, whh)
    for _ in range(num_layer - 1):
        deep.append((args[pos], args[pos + 1], args[pos + 2]))
        pos += 3
    wfc2_ref, bfc2_ref = args[pos], args[pos + 1]
    o_ref = args[pos + 2]                    # (seq, batch, feat)
    gates_sc = args[pos + 3]                 # (seq*batch, 4*hidden) f32 scratch

    H = hidden

    # ---- weights resident as values, hoisted out of the time loop ----------
    whh = [whh0_ref[...]] + [d[2][...] for d in deep]            # (H, 4H) each
    wih = [None] + [d[0][...] for d in deep]                     # (H, 4H), l >= 1
    bias = [None] + [d[1][...] for d in deep]                    # (1, 4H), l >= 1
    wfc2 = wfc2_ref[...]                                         # (H, feat)
    bfc2 = bfc2_ref[...]                                         # (1, feat)

    # ---- layer-0 input projection (fc1 folded) for the whole sequence ------
    # One lane-dense MXU matmul instead of seq tiny per-step matmuls.
    gates_sc[...] = (
        jnp.dot(x_ref[...], wih0_ref[...], preferred_element_type=jnp.float32)
        + b0_ref[...]
    )

    def cell(g, c_prev):
        # Full-vreg activations (EUP on the whole (batch, 4H) tile), then
        # static lane slices in PyTorch gate order i, f, g, o.
        sig = jax.nn.sigmoid(g)
        th = jnp.tanh(g)
        i_g = sig[:, 0 * H:1 * H]
        f_g = sig[:, 1 * H:2 * H]
        g_g = th[:, 2 * H:3 * H]
        o_g = sig[:, 3 * H:4 * H]
        c_new = f_g * c_prev + i_g * g_g
        h_new = o_g * jnp.tanh(c_new)
        return h_new, c_new

    def step(t, carry):
        hs, cs = carry
        new_hs, new_cs = [], []
        g = gates_sc[pl.ds(t * batch, batch), :]                 # (batch, 4H)
        inp = None
        for l in range(num_layer):
            if l > 0:
                g = jnp.dot(inp, wih[l], preferred_element_type=jnp.float32) + bias[l]
            g = g + jnp.dot(hs[l], whh[l], preferred_element_type=jnp.float32)
            h_new, c_new = cell(g, cs[l])
            new_hs.append(h_new)
            new_cs.append(c_new)
            inp = h_new
        # fc2 epilogue on the top-layer hidden state; output block stays
        # resident in VMEM -> a single HBM writeback at the end of the call.
        y_t = jnp.dot(inp, wfc2, preferred_element_type=jnp.float32) + bfc2
        o_ref[t] = y_t.astype(o_ref.dtype)
        return tuple(new_hs), tuple(new_cs)

    zeros = tuple(jnp.zeros((batch, H), jnp.float32) for _ in range(num_layer))
    carry = (zeros, zeros)
    if seq <= 32:
        # Fully static unroll: every slice index is a compile-time constant.
        for t in range(seq):
            carry = step(t, carry)
    else:
        lax.fori_loop(0, seq, step, carry)


# ------------------------------ parameters ----------------------------------
def init_lstm0_params(key, feature_dim, hidden_dim, num_layer):
    """PyTorch-convention parameters (same layout as the nn.Module)."""
    def u(k, shape, bound):
        return jax.random.uniform(k, shape, jnp.float32, -bound, bound)

    keys = jax.random.split(key, 4 + 4 * num_layer)
    kf1 = 1.0 / jnp.sqrt(feature_dim)
    k = 1.0 / jnp.sqrt(hidden_dim)
    params = {
        "fc1_w": u(keys[0], (hidden_dim, feature_dim), kf1),
        "fc1_b": u(keys[1], (hidden_dim,), kf1),
        "fc2_w": u(keys[2], (feature_dim, hidden_dim), k),
        "fc2_b": u(keys[3], (feature_dim,), k),
        "lstm": [],
    }
    for l in range(num_layer):
        kk = keys[4 + 4 * l: 8 + 4 * l]
        params["lstm"].append(dict(
            w_ih=u(kk[0], (4 * hidden_dim, hidden_dim), k),
            w_hh=u(kk[1], (4 * hidden_dim, hidden_dim), k),
            b_ih=u(kk[2], (4 * hidden_dim,), k),
            b_hh=u(kk[3], (4 * hidden_dim,), k),
        ))
    return params


def prepare_lstm0_params(raw):
    """One-time prep (outside the forward hot path): transpose weights, sum
    LSTM biases, and fold fc1 into layer-0's input projection."""
    hi = jax.lax.Precision.HIGHEST
    l0 = raw["lstm"][0]
    hidden = l0["w_hh"].shape[1]
    # (x @ W1^T + b1) @ Wih0^T == x @ (W1^T Wih0^T) + (b1 @ Wih0^T)
    wih0 = jnp.matmul(raw["fc1_w"].T, l0["w_ih"].T, precision=hi)       # (feat, 4H)
    b0 = (jnp.matmul(raw["fc1_b"], l0["w_ih"].T, precision=hi)
          + l0["b_ih"] + l0["b_hh"]).reshape(1, 4 * hidden)
    return {
        "wih0": wih0,
        "b0": b0,
        "whh": [layer["w_hh"].T for layer in raw["lstm"]],              # (H, 4H)
        "wih_rest": [layer["w_ih"].T for layer in raw["lstm"][1:]],     # (H, 4H)
        "b_rest": [(layer["b_ih"] + layer["b_hh"]).reshape(1, 4 * hidden)
                   for layer in raw["lstm"][1:]],
        "wfc2": raw["fc2_w"].T,                                         # (H, feat)
        "bfc2": raw["fc2_b"].reshape(1, -1),                            # (1, feat)
    }


# ------------------------------ forward pass ---------------------------------
def lstm0_forward(prep, x):
    """x: (seq, batch, feature) -> (seq, batch, feature). One fused kernel."""
    seq, batch, feat = x.shape
    hidden = prep["whh"][0].shape[0]
    num_layer = len(prep["whh"])
    fourH = 4 * hidden

    x2d = x.reshape(seq * batch, feat)

    inputs = [x2d, prep["wih0"], prep["b0"], prep["whh"][0]]
    in_specs = [
        pl.BlockSpec((seq * batch, feat), lambda i: (0, 0)),
        pl.BlockSpec((feat, fourH), lambda i: (0, 0)),
        pl.BlockSpec((1, fourH), lambda i: (0, 0)),
        pl.BlockSpec((hidden, fourH), lambda i: (0, 0)),
    ]
    for l in range(num_layer - 1):
        inputs += [prep["wih_rest"][l], prep["b_rest"][l], prep["whh"][l + 1]]
        in_specs += [
            pl.BlockSpec((hidden, fourH), lambda i: (0, 0)),
            pl.BlockSpec((1, fourH), lambda i: (0, 0)),
            pl.BlockSpec((hidden, fourH), lambda i: (0, 0)),
        ]
    inputs += [prep["wfc2"], prep["bfc2"]]
    in_specs += [
        pl.BlockSpec((hidden, feat), lambda i: (0, 0)),
        pl.BlockSpec((1, feat), lambda i: (0, 0)),
    ]

    kernel = functools.partial(
        _lstm0_fused_kernel, seq=seq, batch=batch, hidden=hidden,
        num_layer=num_layer)

    return pl.pallas_call(
        kernel,
        out_shape=jax.ShapeDtypeStruct((seq, batch, feat), x.dtype),
        grid_spec=pltpu.PrefetchScalarGridSpec(
            num_scalar_prefetch=0,
            grid=(1,),
            in_specs=in_specs,
            out_specs=pl.BlockSpec((seq, batch, feat), lambda i: (0, 0, 0)),
            scratch_shapes=[pltpu.VMEM((seq * batch, fourH), jnp.float32)],
        ),
        compiler_params=pltpu.CompilerParams(
            dimension_semantics=("arbitrary",)),
    )(*inputs)


# --------------------------- pure-JAX reference ------------------------------
def lstm0_reference(raw, x):
    """Eval-mode reference matching the PyTorch module semantics."""
    seq, batch, _ = x.shape
    y = x @ raw["fc1_w"].T + raw["fc1_b"]
    for layer in raw["lstm"]:
        H = layer["w_hh"].shape[1]
        b = layer["b_ih"] + layer["b_hh"]
        h = jnp.zeros((batch, H), jnp.float32)
        c = jnp.zeros((batch, H), jnp.float32)
        outs = []
        for t in range(seq):
            g = y[t] @ layer["w_ih"].T + h @ layer["w_hh"].T + b
            i = jax.nn.sigmoid(g[:, 0 * H:1 * H])
            f = jax.nn.sigmoid(g[:, 1 * H:2 * H])
            gg = jnp.tanh(g[:, 2 * H:3 * H])
            o = jax.nn.sigmoid(g[:, 3 * H:4 * H])
            c = f * c + i * gg
            h = o * jnp.tanh(c)
            outs.append(h)
        y = jnp.stack(outs, axis=0)
    return y @ raw["fc2_w"].T + raw["fc2_b"]


if __name__ == "__main__":
    seq, batch = 8, 2
    feature_dim, hidden_dim, num_layer = 16, 32, 2

    key = jax.random.PRNGKey(0)
    kx, kp = jax.random.split(key)
    x = jax.random.normal(kx, (seq, batch, feature_dim), jnp.float32)
    raw = init_lstm0_params(kp, feature_dim, hidden_dim, num_layer)
    prep = prepare_lstm0_params(raw)

    out = lstm0_forward(prep, x)
    jax.block_until_ready(out)
    assert out.shape == (seq, batch, feature_dim)

    ref = lstm0_reference(raw, x)
    assert float(jnp.max(jnp.abs(out - ref))) < 2e-2

    print("KERNEL_OK")
</pallas_src>

<mosaic_0001>
module attributes {stable_mosaic.version = 11 : i64} {
  func.func @_lstm0_fused_kernel(%arg0: i32, %arg1: memref<16x16xf32, #tpu.memory_space<vmem>>, %arg2: memref<16x128xf32, #tpu.memory_space<vmem>>, %arg3: memref<1x128xf32, #tpu.memory_space<vmem>>, %arg4: memref<32x128xf32, #tpu.memory_space<vmem>>, %arg5: memref<32x128xf32, #tpu.memory_space<vmem>>, %arg6: memref<1x128xf32, #tpu.memory_space<vmem>>, %arg7: memref<32x128xf32, #tpu.memory_space<vmem>>, %arg8: memref<32x16xf32, #tpu.memory_space<vmem>>, %arg9: memref<1x16xf32, #tpu.memory_space<vmem>>, %arg10: memref<8x2x16xf32, #tpu.memory_space<vmem>>, %arg11: memref<16x128xf32, #tpu.memory_space<vmem>>) attributes {dimension_semantics = [#tpu.dimension_semantics<arbitrary>], iteration_bounds = array<i64: 1>, scalar_prefetch = 0 : i64, scratch_operands = 1 : i64, tpu.core_type = #tpu.core_type<tc>, window_params = [{pipeline_mode = #tpu.pipeline_mode<synchronous>, transform_indices = @transform_0, window_bounds = array<i64: 16, 16>}, {pipeline_mode = #tpu.pipeline_mode<synchronous>, transform_indices = @transform_1, window_bounds = array<i64: 16, 128>}, {pipeline_mode = #tpu.pipeline_mode<synchronous>, transform_indices = @transform_2, window_bounds = array<i64: 1, 128>}, {pipeline_mode = #tpu.pipeline_mode<synchronous>, transform_indices = @transform_3, window_bounds = array<i64: 32, 128>}, {pipeline_mode = #tpu.pipeline_mode<synchronous>, transform_indices = @transform_4, window_bounds = array<i64: 32, 128>}, {pipeline_mode = #tpu.pipeline_mode<synchronous>, transform_indices = @transform_5, window_bounds = array<i64: 1, 128>}, {pipeline_mode = #tpu.pipeline_mode<synchronous>, transform_indices = @transform_6, window_bounds = array<i64: 32, 128>}, {pipeline_mode = #tpu.pipeline_mode<synchronous>, transform_indices = @transform_7, window_bounds = array<i64: 32, 16>}, {pipeline_mode = #tpu.pipeline_mode<synchronous>, transform_indices = @transform_8, window_bounds = array<i64: 1, 16>}, {pipeline_mode = #tpu.pipeline_mode<synchronous>, transform_indices = @transform_9, window_bounds = array<i64: 8, 2, 16>}]} {
    %c0 = arith.constant 0 : index
    %c0_0 = arith.constant 0 : index
    %0 = vector.load %arg4[%c0, %c0_0] : memref<32x128xf32, #tpu.memory_space<vmem>>, vector<32x128xf32>
    %c0_1 = arith.constant 0 : index
    %c0_2 = arith.constant 0 : index
    %1 = vector.load %arg7[%c0_1, %c0_2] : memref<32x128xf32, #tpu.memory_space<vmem>>, vector<32x128xf32>
    %c0_3 = arith.constant 0 : index
    %c0_4 = arith.constant 0 : index
    %2 = vector.load %arg5[%c0_3, %c0_4] : memref<32x128xf32, #tpu.memory_space<vmem>>, vector<32x128xf32>
    %c0_5 = arith.constant 0 : index
    %c0_6 = arith.constant 0 : index
    %3 = vector.load %arg6[%c0_5, %c0_6] : memref<1x128xf32, #tpu.memory_space<vmem>>, vector<1x128xf32>
    %c0_7 = arith.constant 0 : index
    %c0_8 = arith.constant 0 : index
    %4 = vector.load %arg8[%c0_7, %c0_8] : memref<32x16xf32, #tpu.memory_space<vmem>>, vector<32x16xf32>
    %c0_9 = arith.constant 0 : index
    %c0_10 = arith.constant 0 : index
    %5 = vector.load %arg9[%c0_9, %c0_10] : memref<1x16xf32, #tpu.memory_space<vmem>>, vector<1x16xf32>
    %c0_11 = arith.constant 0 : index
    %c0_12 = arith.constant 0 : index
    %6 = vector.load %arg1[%c0_11, %c0_12] : memref<16x16xf32, #tpu.memory_space<vmem>>, vector<16x16xf32>
    %c0_13 = arith.constant 0 : index
    %c0_14 = arith.constant 0 : index
    %7 = vector.load %arg2[%c0_13, %c0_14] : memref<16x128xf32, #tpu.memory_space<vmem>>, vector<16x128xf32>
    %cst = arith.constant dense<0.000000e+00> : vector<16x128xf32>
    %8 = tpu.matmul %6, %7, %cst {dimension_numbers = #tpu.dot_dimension_numbers<[1], [0], [0], [1], [0, 0, 1, 1], [], []>} : vector<16x16xf32>, vector<16x128xf32>, vector<16x128xf32> -> vector<16x128xf32>
    %c0_15 = arith.constant 0 : index
    %c0_16 = arith.constant 0 : index
    %9 = vector.load %arg3[%c0_15, %c0_16] : memref<1x128xf32, #tpu.memory_space<vmem>>, vector<1x128xf32>
    %10 = vector.broadcast %9 : vector<1x128xf32> to vector<16x128xf32>
    %11 = arith.addf %8, %10 : vector<16x128xf32>
    %c0_17 = arith.constant 0 : index
    %c0_18 = arith.constant 0 : index
    %12 = vector.load %arg11[%c0_17, %c0_18] : memref<16x128xf32, #tpu.memory_space<vmem>>, vector<16x128xf32>
    tpu.vector_store %arg11[%c0_17, %c0_18], %11 {strides = array<i32>} : memref<16x128xf32, #tpu.memory_space<vmem>>, vector<16x128xf32>,
    %cst_19 = arith.constant 0.000000e+00 : f32
    %13 = vector.broadcast %cst_19 : f32 to vector<2x32xf32>
    %cst_20 = arith.constant 0.000000e+00 : f32
    %14 = vector.broadcast %cst_20 : f32 to vector<2x32xf32>
    %c0_21 = arith.constant 0 : index
    %c0_22 = arith.constant 0 : index
    %15 = vector.load %arg11[%c0_21, %c0_22] : memref<16x128xf32, #tpu.memory_space<vmem>>, vector<2x128xf32>
    %cst_23 = arith.constant dense<0.000000e+00> : vector<2x128xf32>
    %16 = tpu.matmul %13, %0, %cst_23 {dimension_numbers = #tpu.dot_dimension_numbers<[1], [0], [0], [1], [0, 0, 1, 1], [], []>} : vector<2x32xf32>, vector<32x128xf32>, vector<2x128xf32> -> vector<2x128xf32>
    %17 = arith.addf %15, %16 : vector<2x128xf32>
    %18 = arith.negf %17 : vector<2x128xf32>
    %19 = math.exp %18 : vector<2x128xf32>
    %cst_24 = arith.constant 1.000000e+00 : f32
    %20 = vector.broadcast %cst_24 : f32 to vector<2x128xf32>
    %21 = arith.addf %20, %19 : vector<2x128xf32>
    %22 = arith.divf %20, %21 : vector<2x128xf32>
    %23 = math.tanh %17 : vector<2x128xf32>
    %24 = vector.extract_strided_slice %22 {offsets = [0, 0], sizes = [2, 32], strides = [1, 1]} : vector<2x128xf32> to vector<2x32xf32>
    %25 = vector.extract_strided_slice %22 {offsets = [0, 32], sizes = [2, 32], strides = [1, 1]} : vector<2x128xf32> to vector<2x32xf32>
    %26 = vector.extract_strided_slice %23 {offsets = [0, 64], sizes = [2, 32], strides = [1, 1]} : vector<2x128xf32> to vector<2x32xf32>
    %27 = vector.extract_strided_slice %22 {offsets = [0, 96], sizes = [2, 32], strides = [1, 1]} : vector<2x128xf32> to vector<2x32xf32>
    %28 = arith.mulf %25, %13 : vector<2x32xf32>
    %29 = arith.mulf %24, %26 : vector<2x32xf32>
    %30 = arith.addf %28, %29 : vector<2x32xf32>
    %31 = math.tanh %30 : vector<2x32xf32>
    %32 = arith.mulf %27, %31 : vector<2x32xf32>
    %cst_25 = arith.constant dense<0.000000e+00> : vector<2x128xf32>
    %33 = tpu.matmul %32, %2, %cst_25 {dimension_numbers = #tpu.dot_dimension_numbers<[1], [0], [0], [1], [0, 0, 1, 1], [], []>} : vector<2x32xf32>, vector<32x128xf32>, vector<2x128xf32> -> vector<2x128xf32>
    %34 = vector.broadcast %3 : vector<1x128xf32> to vector<2x128xf32>
    %35 = arith.addf %33, %34 : vector<2x128xf32>
    %cst_26 = arith.constant dense<0.000000e+00> : vector<2x128xf32>
    %36 = tpu.matmul %14, %1, %cst_26 {dimension_numbers = #tpu.dot_dimension_numbers<[1], [0], [0], [1], [0, 0, 1, 1], [], []>} : vector<2x32xf32>, vector<32x128xf32>, vector<2x128xf32> -> vector<2x128xf32>
    %37 = arith.addf %35, %36 : vector<2x128xf32>
    %38 = arith.negf %37 : vector<2x128xf32>
    %39 = math.exp %38 : vector<2x128xf32>
    %cst_27 = arith.constant 1.000000e+00 : f32
    %40 = vector.broadcast %cst_27 : f32 to vector<2x128xf32>
    %41 = arith.addf %40, %39 : vector<2x128xf32>
    %42 = arith.divf %40, %41 : vector<2x128xf32>
    %43 = math.tanh %37 : vector<2x128xf32>
    %44 = vector.extract_strided_slice %42 {offsets = [0, 0], sizes = [2, 32], strides = [1, 1]} : vector<2x128xf32> to vector<2x32xf32>
    %45 = vector.extract_strided_slice %42 {offsets = [0, 32], sizes = [2, 32], strides = [1, 1]} : vector<2x128xf32> to vector<2x32xf32>
    %46 = vector.extract_strided_slice %43 {offsets = [0, 64], sizes = [2, 32], strides = [1, 1]} : vector<2x128xf32> to vector<2x32xf32>
    %47 = vector.extract_strided_slice %42 {offsets = [0, 96], sizes = [2, 32], strides = [1, 1]} : vector<2x128xf32> to vector<2x32xf32>
    %48 = arith.mulf %45, %14 : vector<2x32xf32>
    %49 = arith.mulf %44, %46 : vector<2x32xf32>
    %50 = arith.addf %48, %49 : vector<2x32xf32>
    %51 = math.tanh %50 : vector<2x32xf32>
    %52 = arith.mulf %47, %51 : vector<2x32xf32>
    %cst_28 = arith.constant dense<0.000000e+00> : vector<2x16xf32>
    %53 = tpu.matmul %52, %4, %cst_28 {dimension_numbers = #tpu.dot_dimension_numbers<[1], [0], [0], [1], [0, 0, 1, 1], [], []>} : vector<2x32xf32>, vector<32x16xf32>, vector<2x16xf32> -> vector<2x16xf32>
    %54 = vector.broadcast %5 : vector<1x16xf32> to vector<2x16xf32>
    %55 = arith.addf %53, %54 : vector<2x16xf32>
    %c0_29 = arith.constant 0 : index
    %c0_30 = arith.constant 0 : index
    %c0_31 = arith.constant 0 : index
    %56 = vector.load %arg10[%c0_29, %c0_30, %c0_31] : memref<8x2x16xf32, #tpu.memory_space<vmem>>, vector<1x2x16xf32>
    %57 = vector.shape_cast %56 : vector<1x2x16xf32> to vector<2x16xf32>
    %58 = vector.shape_cast %55 : vector<2x16xf32> to vector<1x2x16xf32>
    tpu.vector_store %arg10[%c0_29, %c0_30, %c0_31], %58 {strides = array<i32>} : memref<8x2x16xf32, #tpu.memory_space<vmem>>, vector<1x2x16xf32>,
    %c2 = arith.constant 2 : index
    %c0_32 = arith.constant 0 : index
    %59 = vector.load %arg11[%c2, %c0_32] : memref<16x128xf32, #tpu.memory_space<vmem>>, vector<2x128xf32>
    %cst_33 = arith.constant dense<0.000000e+00> : vector<2x128xf32>
    %60 = tpu.matmul %32, %0, %cst_33 {dimension_numbers = #tpu.dot_dimension_numbers<[1], [0], [0], [1], [0, 0, 1, 1], [], []>} : vector<2x32xf32>, vector<32x128xf32>, vector<2x128xf32> -> vector<2x128xf32>
    %61 = arith.addf %59, %60 : vector<2x128xf32>
    %62 = arith.negf %61 : vector<2x128xf32>
    %63 = math.exp %62 : vector<2x128xf32>
    %cst_34 = arith.constant 1.000000e+00 : f32
    %64 = vector.broadcast %cst_34 : f32 to vector<2x128xf32>
    %65 = arith.addf %64, %63 : vector<2x128xf32>
    %66 = arith.divf %64, %65 : vector<2x128xf32>
    %67 = math.tanh %61 : vector<2x128xf32>
    %68 = vector.extract_strided_slice %66 {offsets = [0, 0], sizes = [2, 32], strides = [1, 1]} : vector<2x128xf32> to vector<2x32xf32>
    %69 = vector.extract_strided_slice %66 {offsets = [0, 32], sizes = [2, 32], strides = [1, 1]} : vector<2x128xf32> to vector<2x32xf32>
    %70 = vector.extract_strided_slice %67 {offsets = [0, 64], sizes = [2, 32], strides = [1, 1]} : vector<2x128xf32> to vector<2x32xf32>
    %71 = vector.extract_strided_slice %66 {offsets = [0, 96], sizes = [2, 32], strides = [1, 1]} : vector<2x128xf32> to vector<2x32xf32>
    %72 = arith.mulf %69, %30 : vector<2x32xf32>
    %73 = arith.mulf %68, %70 : vector<2x32xf32>
    %74 = arith.addf %72, %73 : vector<2x32xf32>
    %75 = math.tanh %74 : vector<2x32xf32>
    %76 = arith.mulf %71, %75 : vector<2x32xf32>
    %cst_35 = arith.constant dense<0.000000e+00> : vector<2x128xf32>
    %77 = tpu.matmul %76, %2, %cst_35 {dimension_numbers = #tpu.dot_dimension_numbers<[1], [0], [0], [1], [0, 0, 1, 1], [], []>} : vector<2x32xf32>, vector<32x128xf32>, vector<2x128xf32> -> vector<2x128xf32>
    %78 = vector.broadcast %3 : vector<1x128xf32> to vector<2x128xf32>
    %79 = arith.addf %77, %78 : vector<2x128xf32>
    %cst_36 = arith.constant dense<0.000000e+00> : vector<2x128xf32>
    %80 = tpu.matmul %52, %1, %cst_36 {dimension_numbers = #tpu.dot_dimension_numbers<[1], [0], [0], [1], [0, 0, 1, 1], [], []>} : vector<2x32xf32>, vector<32x128xf32>, vector<2x128xf32> -> vector<2x128xf32>
    %81 = arith.addf %79, %80 : vector<2x128xf32>
    %82 = arith.negf %81 : vector<2x128xf32>
    %83 = math.exp %82 : vector<2x128xf32>
    %cst_37 = arith.constant 1.000000e+00 : f32
    %84 = vector.broadcast %cst_37 : f32 to vector<2x128xf32>
    %85 = arith.addf %84, %83 : vector<2x128xf32>
    %86 = arith.divf %84, %85 : vector<2x128xf32>
    %87 = math.tanh %81 : vector<2x128xf32>
    %88 = vector.extract_strided_slice %86 {offsets = [0, 0], sizes = [2, 32], strides = [1, 1]} : vector<2x128xf32> to vector<2x32xf32>
    %89 = vector.extract_strided_slice %86 {offsets = [0, 32], sizes = [2, 32], strides = [1, 1]} : vector<2x128xf32> to vector<2x32xf32>
    %90 = vector.extract_strided_slice %87 {offsets = [0, 64], sizes = [2, 32], strides = [1, 1]} : vector<2x128xf32> to vector<2x32xf32>
    %91 = vector.extract_strided_slice %86 {offsets = [0, 96], sizes = [2, 32], strides = [1, 1]} : vector<2x128xf32> to vector<2x32xf32>
    %92 = arith.mulf %89, %50 : vector<2x32xf32>
    %93 = arith.mulf %88, %90 : vector<2x32xf32>
    %94 = arith.addf %92, %93 : vector<2x32xf32>
    %95 = math.tanh %94 : vector<2x32xf32>
    %96 = arith.mulf %91, %95 : vector<2x32xf32>
    %cst_38 = arith.constant dense<0.000000e+00> : vector<2x16xf32>
    %97 = tpu.matmul %96, %4, %cst_38 {dimension_numbers = #tpu.dot_dimension_numbers<[1], [0], [0], [1], [0, 0, 1, 1], [], []>} : vector<2x32xf32>, vector<32x16xf32>, vector<2x16xf32> -> vector<2x16xf32>
    %98 = vector.broadcast %5 : vector<1x16xf32> to vector<2x16xf32>
    %99 = arith.addf %97, %98 : vector<2x16xf32>
    %c1 = arith.constant 1 : index
    %c0_39 = arith.constant 0 : index
    %c0_40 = arith.constant 0 : index
    %100 = vector.load %arg10[%c1, %c0_39, %c0_40] : memref<8x2x16xf32, #tpu.memory_space<vmem>>, vector<1x2x16xf32>
    %101 = vector.shape_cast %100 : vector<1x2x16xf32> to vector<2x16xf32>
    %102 = vector.shape_cast %99 : vector<2x16xf32> to vector<1x2x16xf32>
    tpu.vector_store %arg10[%c1, %c0_39, %c0_40], %102 {strides = array<i32>} : memref<8x2x16xf32, #tpu.memory_space<vmem>>, vector<1x2x16xf32>,
    %c4 = arith.constant 4 : index
    %c0_41 = arith.constant 0 : index
    %103 = vector.load %arg11[%c4, %c0_41] : memref<16x128xf32, #tpu.memory_space<vmem>>, vector<2x128xf32>
    %cst_42 = arith.constant dense<0.000000e+00> : vector<2x128xf32>
    %104 = tpu.matmul %76, %0, %cst_42 {dimension_numbers = #tpu.dot_dimension_numbers<[1], [0], [0], [1], [0, 0, 1, 1], [], []>} : vector<2x32xf32>, vector<32x128xf32>, vector<2x128xf32> -> vector<2x128xf32>
    %105 = arith.addf %103, %104 : vector<2x128xf32>
    %106 = arith.negf %105 : vector<2x128xf32>
    %107 = math.exp %106 : vector<2x128xf32>
    %cst_43 = arith.constant 1.000000e+00 : f32
    %108 = vector.broadcast %cst_43 : f32 to vector<2x128xf32>
    %109 = arith.addf %108, %107 : vector<2x128xf32>
    %110 = arith.divf %108, %109 : vector<2x128xf32>
    %111 = math.tanh %105 : vector<2x128xf32>
    %112 = vector.extract_strided_slice %110 {offsets = [0, 0], sizes = [2, 32], strides = [1, 1]} : vector<2x128xf32> to vector<2x32xf32>
    %113 = vector.extract_strided_slice %110 {offsets = [0, 32], sizes = [2, 32], strides = [1, 1]} : vector<2x128xf32> to vector<2x32xf32>
    %114 = vector.extract_strided_slice %111 {offsets = [0, 64], sizes = [2, 32], strides = [1, 1]} : vector<2x128xf32> to vector<2x32xf32>
    %115 = vector.extract_strided_slice %110 {offsets = [0, 96], sizes = [2, 32], strides = [1, 1]} : vector<2x128xf32> to vector<2x32xf32>
    %116 = arith.mulf %113, %74 : vector<2x32xf32>
    %117 = arith.mulf %112, %114 : vector<2x32xf32>
    %118 = arith.addf %116, %117 : vector<2x32xf32>
    %119 = math.tanh %118 : vector<2x32xf32>
    %120 = arith.mulf %115, %119 : vector<2x32xf32>
    %cst_44 = arith.constant dense<0.000000e+00> : vector<2x128xf32>
    %121 = tpu.matmul %120, %2, %cst_44 {dimension_numbers = #tpu.dot_dimension_numbers<[1], [0], [0], [1], [0, 0, 1, 1], [], []>} : vector<2x32xf32>, vector<32x128xf32>, vector<2x128xf32> -> vector<2x128xf32>
    %122 = vector.broadcast %3 : vector<1x128xf32> to vector<2x128xf32>
    %123 = arith.addf %121, %122 : vector<2x128xf32>
    %cst_45 = arith.constant dense<0.000000e+00> : vector<2x128xf32>
    %124 = tpu.matmul %96, %1, %cst_45 {dimension_numbers = #tpu.dot_dimension_numbers<[1], [0], [0], [1], [0, 0, 1, 1], [], []>} : vector<2x32xf32>, vector<32x128xf32>, vector<2x128xf32> -> vector<2x128xf32>
    %125 = arith.addf %123, %124 : vector<2x128xf32>
    %126 = arith.negf %125 : vector<2x128xf32>
    %127 = math.exp %126 : vector<2x128xf32>
    %cst_46 = arith.constant 1.000000e+00 : f32
    %128 = vector.broadcast %cst_46 : f32 to vector<2x128xf32>
    %129 = arith.addf %128, %127 : vector<2x128xf32>
    %130 = arith.divf %128, %129 : vector<2x128xf32>
    %131 = math.tanh %125 : vector<2x128xf32>
    %132 = vector.extract_strided_slice %130 {offsets = [0, 0], sizes = [2, 32], strides = [1, 1]} : vector<2x128xf32> to vector<2x32xf32>
    %133 = vector.extract_strided_slice %130 {offsets = [0, 32], sizes = [2, 32], strides = [1, 1]} : vector<2x128xf32> to vector<2x32xf32>
    %134 = vector.extract_strided_slice %131 {offsets = [0, 64], sizes = [2, 32], strides = [1, 1]} : vector<2x128xf32> to vector<2x32xf32>
    %135 = vector.extract_strided_slice %130 {offsets = [0, 96], sizes = [2, 32], strides = [1, 1]} : vector<2x128xf32> to vector<2x32xf32>
    %136 = arith.mulf %133, %94 : vector<2x32xf32>
    %137 = arith.mulf %132, %134 : vector<2x32xf32>
    %138 = arith.addf %136, %137 : vector<2x32xf32>
    %139 = math.tanh %138 : vector<2x32xf32>
    %140 = arith.mulf %135, %139 : vector<2x32xf32>
    %cst_47 = arith.constant dense<0.000000e+00> : vector<2x16xf32>
    %141 = tpu.matmul %140, %4, %cst_47 {dimension_numbers = #tpu.dot_dimension_numbers<[1], [0], [0], [1], [0, 0, 1, 1], [], []>} : vector<2x32xf32>, vector<32x16xf32>, vector<2x16xf32> -> vector<2x16xf32>
    %142 = vector.broadcast %5 : vector<1x16xf32> to vector<2x16xf32>
    %143 = arith.addf %141, %142 : vector<2x16xf32>
    %c2_48 = arith.constant 2 : index
    %c0_49 = arith.constant 0 : index
    %c0_50 = arith.constant 0 : index
    %144 = vector.load %arg10[%c2_48, %c0_49, %c0_50] : memref<8x2x16xf32, #tpu.memory_space<vmem>>, vector<1x2x16xf32>
    %145 = vector.shape_cast %144 : vector<1x2x16xf32> to vector<2x16xf32>
    %146 = vector.shape_cast %143 : vector<2x16xf32> to vector<1x2x16xf32>
    tpu.vector_store %arg10[%c2_48, %c0_49, %c0_50], %146 {strides = array<i32>} : memref<8x2x16xf32, #tpu.memory_space<vmem>>, vector<1x2x16xf32>,
    %c6 = arith.constant 6 : index
    %c0_51 = arith.constant 0 : index
    %147 = vector.load %arg11[%c6, %c0_51] : memref<16x128xf32, #tpu.memory_space<vmem>>, vector<2x128xf32>
    %cst_52 = arith.constant dense<0.000000e+00> : vector<2x128xf32>
    %148 = tpu.matmul %120, %0, %cst_52 {dimension_numbers = #tpu.dot_dimension_numbers<[1], [0], [0], [1], [0, 0, 1, 1], [], []>} : vector<2x32xf32>, vector<32x128xf32>, vector<2x128xf32> -> vector<2x128xf32>
    %149 = arith.addf %147, %148 : vector<2x128xf32>
    %150 = arith.negf %149 : vector<2x128xf32>
    %151 = math.exp %150 : vector<2x128xf32>
    %cst_53 = arith.constant 1.000000e+00 : f32
    %152 = vector.broadcast %cst_53 : f32 to vector<2x128xf32>
    %153 = arith.addf %152, %151 : vector<2x128xf32>
    %154 = arith.divf %152, %153 : vector<2x128xf32>
    %155 = math.tanh %149 : vector<2x128xf32>
    %156 = vector.extract_strided_slice %154 {offsets = [0, 0], sizes = [2, 32], strides = [1, 1]} : vector<2x128xf32> to vector<2x32xf32>
    %157 = vector.extract_strided_slice %154 {offsets = [0, 32], sizes = [2, 32], strides = [1, 1]} : vector<2x128xf32> to vector<2x32xf32>
    %158 = vector.extract_strided_slice %155 {offsets = [0, 64], sizes = [2, 32], strides = [1, 1]} : vector<2x128xf32> to vector<2x32xf32>
    %159 = vector.extract_strided_slice %154 {offsets = [0, 96], sizes = [2, 32], strides = [1, 1]} : vector<2x128xf32> to vector<2x32xf32>
    %160 = arith.mulf %157, %118 : vector<2x32xf32>
    %161 = arith.mulf %156, %158 : vector<2x32xf32>
    %162 = arith.addf %160, %161 : vector<2x32xf32>
    %163 = math.tanh %162 : vector<2x32xf32>
    %164 = arith.mulf %159, %163 : vector<2x32xf32>
    %cst_54 = arith.constant dense<0.000000e+00> : vector<2x128xf32>
    %165 = tpu.matmul %164, %2, %cst_54 {dimension_numbers = #tpu.dot_dimension_numbers<[1], [0], [0], [1], [0, 0, 1, 1], [], []>} : vector<2x32xf32>, vector<32x128xf32>, vector<2x128xf32> -> vector<2x128xf32>
    %166 = vector.broadcast %3 : vector<1x128xf32> to vector<2x128xf32>
    %167 = arith.addf %165, %166 : vector<2x128xf32>
    %cst_55 = arith.constant dense<0.000000e+00> : vector<2x128xf32>
    %168 = tpu.matmul %140, %1, %cst_55 {dimension_numbers = #tpu.dot_dimension_numbers<[1], [0], [0], [1], [0, 0, 1, 1], [], []>} : vector<2x32xf32>, vector<32x128xf32>, vector<2x128xf32> -> vector<2x128xf32>
    %169 = arith.addf %167, %168 : vector<2x128xf32>
    %170 = arith.negf %169 : vector<2x128xf32>
    %171 = math.exp %170 : vector<2x128xf32>
    %cst_56 = arith.constant 1.000000e+00 : f32
    %172 = vector.broadcast %cst_56 : f32 to vector<2x128xf32>
    %173 = arith.addf %172, %171 : vector<2x128xf32>
    %174 = arith.divf %172, %173 : vector<2x128xf32>
    %175 = math.tanh %169 : vector<2x128xf32>
    %176 = vector.extract_strided_slice %174 {offsets = [0, 0], sizes = [2, 32], strides = [1, 1]} : vector<2x128xf32> to vector<2x32xf32>
    %177 = vector.extract_strided_slice %174 {offsets = [0, 32], sizes = [2, 32], strides = [1, 1]} : vector<2x128xf32> to vector<2x32xf32>
    %178 = vector.extract_strided_slice %175 {offsets = [0, 64], sizes = [2, 32], strides = [1, 1]} : vector<2x128xf32> to vector<2x32xf32>
    %179 = vector.extract_strided_slice %174 {offsets = [0, 96], sizes = [2, 32], strides = [1, 1]} : vector<2x128xf32> to vector<2x32xf32>
    %180 = arith.mulf %177, %138 : vector<2x32xf32>
    %181 = arith.mulf %176, %178 : vector<2x32xf32>
    %182 = arith.addf %180, %181 : vector<2x32xf32>
    %183 = math.tanh %182 : vector<2x32xf32>
    %184 = arith.mulf %179, %183 : vector<2x32xf32>
    %cst_57 = arith.constant dense<0.000000e+00> : vector<2x16xf32>
    %185 = tpu.matmul %184, %4, %cst_57 {dimension_numbers = #tpu.dot_dimension_numbers<[1], [0], [0], [1], [0, 0, 1, 1], [], []>} : vector<2x32xf32>, vector<32x16xf32>, vector<2x16xf32> -> vector<2x16xf32>
    %186 = vector.broadcast %5 : vector<1x16xf32> to vector<2x16xf32>
    %187 = arith.addf %185, %186 : vector<2x16xf32>
    %c3 = arith.constant 3 : index
    %c0_58 = arith.constant 0 : index
    %c0_59 = arith.constant 0 : index
    %188 = vector.load %arg10[%c3, %c0_58, %c0_59] : memref<8x2x16xf32, #tpu.memory_space<vmem>>, vector<1x2x16xf32>
    %189 = vector.shape_cast %188 : vector<1x2x16xf32> to vector<2x16xf32>
    %190 = vector.shape_cast %187 : vector<2x16xf32> to vector<1x2x16xf32>
    tpu.vector_store %arg10[%c3, %c0_58, %c0_59], %190 {strides = array<i32>} : memref<8x2x16xf32, #tpu.memory_space<vmem>>, vector<1x2x16xf32>,
    %c8 = arith.constant 8 : index
    %c0_60 = arith.constant 0 : index
    %191 = vector.load %arg11[%c8, %c0_60] : memref<16x128xf32, #tpu.memory_space<vmem>>, vector<2x128xf32>
    %cst_61 = arith.constant dense<0.000000e+00> : vector<2x128xf32>
    %192 = tpu.matmul %164, %0, %cst_61 {dimension_numbers = #tpu.dot_dimension_numbers<[1], [0], [0], [1], [0, 0, 1, 1], [], []>} : vector<2x32xf32>, vector<32x128xf32>, vector<2x128xf32> -> vector<2x128xf32>
    %193 = arith.addf %191, %192 : vector<2x128xf32>
    %194 = arith.negf %193 : vector<2x128xf32>
    %195 = math.exp %194 : vector<2x128xf32>
    %cst_62 = arith.constant 1.000000e+00 : f32
    %196 = vector.broadcast %cst_62 : f32 to vector<2x128xf32>
    %197 = arith.addf %196, %195 : vector<2x128xf32>
    %198 = arith.divf %196, %197 : vector<2x128xf32>
    %199 = math.tanh %193 : vector<2x128xf32>
    %200 = vector.extract_strided_slice %198 {offsets = [0, 0], sizes = [2, 32], strides = [1, 1]} : vector<2x128xf32> to vector<2x32xf32>
    %201 = vector.extract_strided_slice %198 {offsets = [0, 32], sizes = [2, 32], strides = [1, 1]} : vector<2x128xf32> to vector<2x32xf32>
    %202 = vector.extract_strided_slice %199 {offsets = [0, 64], sizes = [2, 32], strides = [1, 1]} : vector<2x128xf32> to vector<2x32xf32>
    %203 = vector.extract_strided_slice %198 {offsets = [0, 96], sizes = [2, 32], strides = [1, 1]} : vector<2x128xf32> to vector<2x32xf32>
    %204 = arith.mulf %201, %162 : vector<2x32xf32>
    %205 = arith.mulf %200, %202 : vector<2x32xf32>
    %206 = arith.addf %204, %205 : vector<2x32xf32>
    %207 = math.tanh %206 : vector<2x32xf32>
    %208 = arith.mulf %203, %207 : vector<2x32xf32>
    %cst_63 = arith.constant dense<0.000000e+00> : vector<2x128xf32>
    %209 = tpu.matmul %208, %2, %cst_63 {dimension_numbers = #tpu.dot_dimension_numbers<[1], [0], [0], [1], [0, 0, 1, 1], [], []>} : vector<2x32xf32>, vector<32x128xf32>, vector<2x128xf32> -> vector<2x128xf32>
    %210 = vector.broadcast %3 : vector<1x128xf32> to vector<2x128xf32>
    %211 = arith.addf %209, %210 : vector<2x128xf32>
    %cst_64 = arith.constant dense<0.000000e+00> : vector<2x128xf32>
    %212 = tpu.matmul %184, %1, %cst_64 {dimension_numbers = #tpu.dot_dimension_numbers<[1], [0], [0], [1], [0, 0, 1, 1], [], []>} : vector<2x32xf32>, vector<32x128xf32>, vector<2x128xf32> -> vector<2x128xf32>
    %213 = arith.addf %211, %212 : vector<2x128xf32>
    %214 = arith.negf %213 : vector<2x128xf32>
    %215 = math.exp %214 : vector<2x128xf32>
    %cst_65 = arith.constant 1.000000e+00 : f32
    %216 = vector.broadcast %cst_65 : f32 to vector<2x128xf32>
    %217 = arith.addf %216, %215 : vector<2x128xf32>
    %218 = arith.divf %216, %217 : vector<2x128xf32>
    %219 = math.tanh %213 : vector<2x128xf32>
    %220 = vector.extract_strided_slice %218 {offsets = [0, 0], sizes = [2, 32], strides = [1, 1]} : vector<2x128xf32> to vector<2x32xf32>
    %221 = vector.extract_strided_slice %218 {offsets = [0, 32], sizes = [2, 32], strides = [1, 1]} : vector<2x128xf32> to vector<2x32xf32>
    %222 = vector.extract_strided_slice %219 {offsets = [0, 64], sizes = [2, 32], strides = [1, 1]} : vector<2x128xf32> to vector<2x32xf32>
    %223 = vector.extract_strided_slice %218 {offsets = [0, 96], sizes = [2, 32], strides = [1, 1]} : vector<2x128xf32> to vector<2x32xf32>
    %224 = arith.mulf %221, %182 : vector<2x32xf32>
    %225 = arith.mulf %220, %222 : vector<2x32xf32>
    %226 = arith.addf %224, %225 : vector<2x32xf32>
    %227 = math.tanh %226 : vector<2x32xf32>
    %228 = arith.mulf %223, %227 : vector<2x32xf32>
    %cst_66 = arith.constant dense<0.000000e+00> : vector<2x16xf32>
    %229 = tpu.matmul %228, %4, %cst_66 {dimension_numbers = #tpu.dot_dimension_numbers<[1], [0], [0], [1], [0, 0, 1, 1], [], []>} : vector<2x32xf32>, vector<32x16xf32>, vector<2x16xf32> -> vector<2x16xf32>
    %230 = vector.broadcast %5 : vector<1x16xf32> to vector<2x16xf32>
    %231 = arith.addf %229, %230 : vector<2x16xf32>
    %c4_67 = arith.constant 4 : index
    %c0_68 = arith.constant 0 : index
    %c0_69 = arith.constant 0 : index
    %232 = vector.load %arg10[%c4_67, %c0_68, %c0_69] : memref<8x2x16xf32, #tpu.memory_space<vmem>>, vector<1x2x16xf32>
    %233 = vector.shape_cast %232 : vector<1x2x16xf32> to vector<2x16xf32>
    %234 = vector.shape_cast %231 : vector<2x16xf32> to vector<1x2x16xf32>
    tpu.vector_store %arg10[%c4_67, %c0_68, %c0_69], %234 {strides = array<i32>} : memref<8x2x16xf32, #tpu.memory_space<vmem>>, vector<1x2x16xf32>,
    %c10 = arith.constant 10 : index
    %c0_70 = arith.constant 0 : index
    %235 = vector.load %arg11[%c10, %c0_70] : memref<16x128xf32, #tpu.memory_space<vmem>>, vector<2x128xf32>
    %cst_71 = arith.constant dense<0.000000e+00> : vector<2x128xf32>
    %236 = tpu.matmul %208, %0, %cst_71 {dimension_numbers = #tpu.dot_dimension_numbers<[1], [0], [0], [1], [0, 0, 1, 1], [], []>} : vector<2x32xf32>, vector<32x128xf32>, vector<2x128xf32> -> vector<2x128xf32>
    %237 = arith.addf %235, %236 : vector<2x128xf32>
    %238 = arith.negf %237 : vector<2x128xf32>
    %239 = math.exp %238 : vector<2x128xf32>
    %cst_72 = arith.constant 1.000000e+00 : f32
    %240 = vector.broadcast %cst_72 : f32 to vector<2x128xf32>
    %241 = arith.addf %240, %239 : vector<2x128xf32>
    %242 = arith.divf %240, %241 : vector<2x128xf32>
    %243 = math.tanh %237 : vector<2x128xf32>
    %244 = vector.extract_strided_slice %242 {offsets = [0, 0], sizes = [2, 32], strides = [1, 1]} : vector<2x128xf32> to vector<2x32xf32>
    %245 = vector.extract_strided_slice %242 {offsets = [0, 32], sizes = [2, 32], strides = [1, 1]} : vector<2x128xf32> to vector<2x32xf32>
    %246 = vector.extract_strided_slice %243 {offsets = [0, 64], sizes = [2, 32], strides = [1, 1]} : vector<2x128xf32> to vector<2x32xf32>
    %247 = vector.extract_strided_slice %242 {offsets = [0, 96], sizes = [2, 32], strides = [1, 1]} : vector<2x128xf32> to vector<2x32xf32>
    %248 = arith.mulf %245, %206 : vector<2x32xf32>
    %249 = arith.mulf %244, %246 : vector<2x32xf32>
    %250 = arith.addf %248, %249 : vector<2x32xf32>
    %251 = math.tanh %250 : vector<2x32xf32>
    %252 = arith.mulf %247, %251 : vector<2x32xf32>
    %cst_73 = arith.constant dense<0.000000e+00> : vector<2x128xf32>
    %253 = tpu.matmul %252, %2, %cst_73 {dimension_numbers = #tpu.dot_dimension_numbers<[1], [0], [0], [1], [0, 0, 1, 1], [], []>} : vector<2x32xf32>, vector<32x128xf32>, vector<2x128xf32> -> vector<2x128xf32>
    %254 = vector.broadcast %3 : vector<1x128xf32> to vector<2x128xf32>
    %255 = arith.addf %253, %254 : vector<2x128xf32>
    %cst_74 = arith.constant dense<0.000000e+00> : vector<2x128xf32>
    %256 = tpu.matmul %228, %1, %cst_74 {dimension_numbers = #tpu.dot_dimension_numbers<[1], [0], [0], [1], [0, 0, 1, 1], [], []>} : vector<2x32xf32>, vector<32x128xf32>, vector<2x128xf32> -> vector<2x128xf32>
    %257 = arith.addf %255, %256 : vector<2x128xf32>
    %258 = arith.negf %257 : vector<2x128xf32>
    %259 = math.exp %258 : vector<2x128xf32>
    %cst_75 = arith.constant 1.000000e+00 : f32
    %260 = vector.broadcast %cst_75 : f32 to vector<2x128xf32>
    %261 = arith.addf %260, %259 : vector<2x128xf32>
    %262 = arith.divf %260, %261 : vector<2x128xf32>
    %263 = math.tanh %257 : vector<2x128xf32>
    %264 = vector.extract_strided_slice %262 {offsets = [0, 0], sizes = [2, 32], strides = [1, 1]} : vector<2x128xf32> to vector<2x32xf32>
    %265 = vector.extract_strided_slice %262 {offsets = [0, 32], sizes = [2, 32], strides = [1, 1]} : vector<2x128xf32> to vector<2x32xf32>
    %266 = vector.extract_strided_slice %263 {offsets = [0, 64], sizes = [2, 32], strides = [1, 1]} : vector<2x128xf32> to vector<2x32xf32>
    %267 = vector.extract_strided_slice %262 {offsets = [0, 96], sizes = [2, 32], strides = [1, 1]} : vector<2x128xf32> to vector<2x32xf32>
    %268 = arith.mulf %265, %226 : vector<2x32xf32>
    %269 = arith.mulf %264, %266 : vector<2x32xf32>
    %270 = arith.addf %268, %269 : vector<2x32xf32>
    %271 = math.tanh %270 : vector<2x32xf32>
    %272 = arith.mulf %267, %271 : vector<2x32xf32>
    %cst_76 = arith.constant dense<0.000000e+00> : vector<2x16xf32>
    %273 = tpu.matmul %272, %4, %cst_76 {dimension_numbers = #tpu.dot_dimension_numbers<[1], [0], [0], [1], [0, 0, 1, 1], [], []>} : vector<2x32xf32>, vector<32x16xf32>, vector<2x16xf32> -> vector<2x16xf32>
    %274 = vector.broadcast %5 : vector<1x16xf32> to vector<2x16xf32>
    %275 = arith.addf %273, %274 : vector<2x16xf32>
    %c5 = arith.constant 5 : index
    %c0_77 = arith.constant 0 : index
    %c0_78 = arith.constant 0 : index
    %276 = vector.load %arg10[%c5, %c0_77, %c0_78] : memref<8x2x16xf32, #tpu.memory_space<vmem>>, vector<1x2x16xf32>
    %277 = vector.shape_cast %276 : vector<1x2x16xf32> to vector<2x16xf32>
    %278 = vector.shape_cast %275 : vector<2x16xf32> to vector<1x2x16xf32>
    tpu.vector_store %arg10[%c5, %c0_77, %c0_78], %278 {strides = array<i32>} : memref<8x2x16xf32, #tpu.memory_space<vmem>>, vector<1x2x16xf32>,
    %c12 = arith.constant 12 : index
    %c0_79 = arith.constant 0 : index
    %279 = vector.load %arg11[%c12, %c0_79] : memref<16x128xf32, #tpu.memory_space<vmem>>, vector<2x128xf32>
    %cst_80 = arith.constant dense<0.000000e+00> : vector<2x128xf32>
    %280 = tpu.matmul %252, %0, %cst_80 {dimension_numbers = #tpu.dot_dimension_numbers<[1], [0], [0], [1], [0, 0, 1, 1], [], []>} : vector<2x32xf32>, vector<32x128xf32>, vector<2x128xf32> -> vector<2x128xf32>
    %281 = arith.addf %279, %280 : vector<2x128xf32>
    %282 = arith.negf %281 : vector<2x128xf32>
    %283 = math.exp %282 : vector<2x128xf32>
    %cst_81 = arith.constant 1.000000e+00 : f32
    %284 = vector.broadcast %cst_81 : f32 to vector<2x128xf32>
    %285 = arith.addf %284, %283 : vector<2x128xf32>
    %286 = arith.divf %284, %285 : vector<2x128xf32>
    %287 = math.tanh %281 : vector<2x128xf32>
    %288 = vector.extract_strided_slice %286 {offsets = [0, 0], sizes = [2, 32], strides = [1, 1]} : vector<2x128xf32> to vector<2x32xf32>
    %289 = vector.extract_strided_slice %286 {offsets = [0, 32], sizes = [2, 32], strides = [1, 1]} : vector<2x128xf32> to vector<2x32xf32>
    %290 = vector.extract_strided_slice %287 {offsets = [0, 64], sizes = [2, 32], strides = [1, 1]} : vector<2x128xf32> to vector<2x32xf32>
    %291 = vector.extract_strided_slice %286 {offsets = [0, 96], sizes = [2, 32], strides = [1, 1]} : vector<2x128xf32> to vector<2x32xf32>
    %292 = arith.mulf %289, %250 : vector<2x32xf32>
    %293 = arith.mulf %288, %290 : vector<2x32xf32>
    %294 = arith.addf %292, %293 : vector<2x32xf32>
    %295 = math.tanh %294 : vector<2x32xf32>
    %296 = arith.mulf %291, %295 : vector<2x32xf32>
    %cst_82 = arith.constant dense<0.000000e+00> : vector<2x128xf32>
    %297 = tpu.matmul %296, %2, %cst_82 {dimension_numbers = #tpu.dot_dimension_numbers<[1], [0], [0], [1], [0, 0, 1, 1], [], []>} : vector<2x32xf32>, vector<32x128xf32>, vector<2x128xf32> -> vector<2x128xf32>
    %298 = vector.broadcast %3 : vector<1x128xf32> to vector<2x128xf32>
    %299 = arith.addf %297, %298 : vector<2x128xf32>
    %cst_83 = arith.constant dense<0.000000e+00> : vector<2x128xf32>
    %300 = tpu.matmul %272, %1, %cst_83 {dimension_numbers = #tpu.dot_dimension_numbers<[1], [0], [0], [1], [0, 0, 1, 1], [], []>} : vector<2x32xf32>, vector<32x128xf32>, vector<2x128xf32> -> vector<2x128xf32>
    %301 = arith.addf %299, %300 : vector<2x128xf32>
    %302 = arith.negf %301 : vector<2x128xf32>
    %303 = math.exp %302 : vector<2x128xf32>
    %cst_84 = arith.constant 1.000000e+00 : f32
    %304 = vector.broadcast %cst_84 : f32 to vector<2x128xf32>
    %305 = arith.addf %304, %303 : vector<2x128xf32>
    %306 = arith.divf %304, %305 : vector<2x128xf32>
    %307 = math.tanh %301 : vector<2x128xf32>
    %308 = vector.extract_strided_slice %306 {offsets = [0, 0], sizes = [2, 32], strides = [1, 1]} : vector<2x128xf32> to vector<2x32xf32>
    %309 = vector.extract_strided_slice %306 {offsets = [0, 32], sizes = [2, 32], strides = [1, 1]} : vector<2x128xf32> to vector<2x32xf32>
    %310 = vector.extract_strided_slice %307 {offsets = [0, 64], sizes = [2, 32], strides = [1, 1]} : vector<2x128xf32> to vector<2x32xf32>
    %311 = vector.extract_strided_slice %306 {offsets = [0, 96], sizes = [2, 32], strides = [1, 1]} : vector<2x128xf32> to vector<2x32xf32>
    %312 = arith.mulf %309, %270 : vector<2x32xf32>
    %313 = arith.mulf %308, %310 : vector<2x32xf32>
    %314 = arith.addf %312, %313 : vector<2x32xf32>
    %315 = math.tanh %314 : vector<2x32xf32>
    %316 = arith.mulf %311, %315 : vector<2x32xf32>
    %cst_85 = arith.constant dense<0.000000e+00> : vector<2x16xf32>
    %317 = tpu.matmul %316, %4, %cst_85 {dimension_numbers = #tpu.dot_dimension_numbers<[1], [0], [0], [1], [0, 0, 1, 1], [], []>} : vector<2x32xf32>, vector<32x16xf32>, vector<2x16xf32> -> vector<2x16xf32>
    %318 = vector.broadcast %5 : vector<1x16xf32> to vector<2x16xf32>
    %319 = arith.addf %317, %318 : vector<2x16xf32>
    %c6_86 = arith.constant 6 : index
    %c0_87 = arith.constant 0 : index
    %c0_88 = arith.constant 0 : index
    %320 = vector.load %arg10[%c6_86, %c0_87, %c0_88] : memref<8x2x16xf32, #tpu.memory_space<vmem>>, vector<1x2x16xf32>
    %321 = vector.shape_cast %320 : vector<1x2x16xf32> to vector<2x16xf32>
    %322 = vector.shape_cast %319 : vector<2x16xf32> to vector<1x2x16xf32>
    tpu.vector_store %arg10[%c6_86, %c0_87, %c0_88], %322 {strides = array<i32>} : memref<8x2x16xf32, #tpu.memory_space<vmem>>, vector<1x2x16xf32>,
    %c14 = arith.constant 14 : index
    %c0_89 = arith.constant 0 : index
    %323 = vector.load %arg11[%c14, %c0_89] : memref<16x128xf32, #tpu.memory_space<vmem>>, vector<2x128xf32>
    %cst_90 = arith.constant dense<0.000000e+00> : vector<2x128xf32>
    %324 = tpu.matmul %296, %0, %cst_90 {dimension_numbers = #tpu.dot_dimension_numbers<[1], [0], [0], [1], [0, 0, 1, 1], [], []>} : vector<2x32xf32>, vector<32x128xf32>, vector<2x128xf32> -> vector<2x128xf32>
    %325 = arith.addf %323, %324 : vector<2x128xf32>
    %326 = arith.negf %325 : vector<2x128xf32>
    %327 = math.exp %326 : vector<2x128xf32>
    %cst_91 = arith.constant 1.000000e+00 : f32
    %328 = vector.broadcast %cst_91 : f32 to vector<2x128xf32>
    %329 = arith.addf %328, %327 : vector<2x128xf32>
    %330 = arith.divf %328, %329 : vector<2x128xf32>
    %331 = math.tanh %325 : vector<2x128xf32>
    %332 = vector.extract_strided_slice %330 {offsets = [0, 0], sizes = [2, 32], strides = [1, 1]} : vector<2x128xf32> to vector<2x32xf32>
    %333 = vector.extract_strided_slice %330 {offsets = [0, 32], sizes = [2, 32], strides = [1, 1]} : vector<2x128xf32> to vector<2x32xf32>
    %334 = vector.extract_strided_slice %331 {offsets = [0, 64], sizes = [2, 32], strides = [1, 1]} : vector<2x128xf32> to vector<2x32xf32>
    %335 = vector.extract_strided_slice %330 {offsets = [0, 96], sizes = [2, 32], strides = [1, 1]} : vector<2x128xf32> to vector<2x32xf32>
    %336 = arith.mulf %333, %294 : vector<2x32xf32>
    %337 = arith.mulf %332, %334 : vector<2x32xf32>
    %338 = arith.addf %336, %337 : vector<2x32xf32>
    %339 = math.tanh %338 : vector<2x32xf32>
    %340 = arith.mulf %335, %339 : vector<2x32xf32>
    %cst_92 = arith.constant dense<0.000000e+00> : vector<2x128xf32>
    %341 = tpu.matmul %340, %2, %cst_92 {dimension_numbers = #tpu.dot_dimension_numbers<[1], [0], [0], [1], [0, 0, 1, 1], [], []>} : vector<2x32xf32>, vector<32x128xf32>, vector<2x128xf32> -> vector<2x128xf32>
    %342 = vector.broadcast %3 : vector<1x128xf32> to vector<2x128xf32>
    %343 = arith.addf %341, %342 : vector<2x128xf32>
    %cst_93 = arith.constant dense<0.000000e+00> : vector<2x128xf32>
    %344 = tpu.matmul %316, %1, %cst_93 {dimension_numbers = #tpu.dot_dimension_numbers<[1], [0], [0], [1], [0, 0, 1, 1], [], []>} : vector<2x32xf32>, vector<32x128xf32>, vector<2x128xf32> -> vector<2x128xf32>
    %345 = arith.addf %343, %344 : vector<2x128xf32>
    %346 = arith.negf %345 : vector<2x128xf32>
    %347 = math.exp %346 : vector<2x128xf32>
    %cst_94 = arith.constant 1.000000e+00 : f32
    %348 = vector.broadcast %cst_94 : f32 to vector<2x128xf32>
    %349 = arith.addf %348, %347 : vector<2x128xf32>
    %350 = arith.divf %348, %349 : vector<2x128xf32>
    %351 = math.tanh %345 : vector<2x128xf32>
    %352 = vector.extract_strided_slice %350 {offsets = [0, 0], sizes = [2, 32], strides = [1, 1]} : vector<2x128xf32> to vector<2x32xf32>
    %353 = vector.extract_strided_slice %350 {offsets = [0, 32], sizes = [2, 32], strides = [1, 1]} : vector<2x128xf32> to vector<2x32xf32>
    %354 = vector.extract_strided_slice %351 {offsets = [0, 64], sizes = [2, 32], strides = [1, 1]} : vector<2x128xf32> to vector<2x32xf32>
    %355 = vector.extract_strided_slice %350 {offsets = [0, 96], sizes = [2, 32], strides = [1, 1]} : vector<2x128xf32> to vector<2x32xf32>
    %356 = arith.mulf %353, %314 : vector<2x32xf32>
    %357 = arith.mulf %352, %354 : vector<2x32xf32>
    %358 = arith.addf %356, %357 : vector<2x32xf32>
    %359 = math.tanh %358 : vector<2x32xf32>
    %360 = arith.mulf %355, %359 : vector<2x32xf32>
    %cst_95 = arith.constant dense<0.000000e+00> : vector<2x16xf32>
    %361 = tpu.matmul %360, %4, %cst_95 {dimension_numbers = #tpu.dot_dimension_numbers<[1], [0], [0], [1], [0, 0, 1, 1], [], []>} : vector<2x32xf32>, vector<32x16xf32>, vector<2x16xf32> -> vector<2x16xf32>
    %362 = vector.broadcast %5 : vector<1x16xf32> to vector<2x16xf32>
    %363 = arith.addf %361, %362 : vector<2x16xf32>
    %c7 = arith.constant 7 : index
    %c0_96 = arith.constant 0 : index
    %c0_97 = arith.constant 0 : index
    %364 = vector.load %arg10[%c7, %c0_96, %c0_97] : memref<8x2x16xf32, #tpu.memory_space<vmem>>, vector<1x2x16xf32>
    %365 = vector.shape_cast %364 : vector<1x2x16xf32> to vector<2x16xf32>
    %366 = vector.shape_cast %363 : vector<2x16xf32> to vector<1x2x16xf32>
    tpu.vector_store %arg10[%c7, %c0_96, %c0_97], %366 {strides = array<i32>} : memref<8x2x16xf32, #tpu.memory_space<vmem>>, vector<1x2x16xf32>,
    return
  }
  func.func @transform_0(%arg0: i32) -> (i32, i32) {
    %c0_i32 = arith.constant 0 : i32
    %c0_i32_0 = arith.constant 0 : i32
    %c0_i32_1 = arith.constant 0 : i32
    return %c0_i32, %c0_i32_0 : i32, i32
  }
  func.func @transform_1(%arg0: i32) -> (i32, i32) {
    %c0_i32 = arith.constant 0 : i32
    %c0_i32_0 = arith.constant 0 : i32
    %c0_i32_1 = arith.constant 0 : i32
    return %c0_i32, %c0_i32_0 : i32, i32
  }
  func.func @transform_2(%arg0: i32) -> (i32, i32) {
    %c0_i32 = arith.constant 0 : i32
    %c0_i32_0 = arith.constant 0 : i32
    %c0_i32_1 = arith.constant 0 : i32
    return %c0_i32, %c0_i32_0 : i32, i32
  }
  func.func @transform_3(%arg0: i32) -> (i32, i32) {
    %c0_i32 = arith.constant 0 : i32
    %c0_i32_0 = arith.constant 0 : i32
    %c0_i32_1 = arith.constant 0 : i32
    return %c0_i32, %c0_i32_0 : i32, i32
  }
  func.func @transform_4(%arg0: i32) -> (i32, i32) {
    %c0_i32 = arith.constant 0 : i32
    %c0_i32_0 = arith.constant 0 : i32
    %c0_i32_1 = arith.constant 0 : i32
    return %c0_i32, %c0_i32_0 : i32, i32
  }
  func.func @transform_5(%arg0: i32) -> (i32, i32) {
    %c0_i32 = arith.constant 0 : i32
    %c0_i32_0 = arith.constant 0 : i32
    %c0_i32_1 = arith.constant 0 : i32
    return %c0_i32, %c0_i32_0 : i32, i32
  }
  func.func @transform_6(%arg0: i32) -> (i32, i32) {
    %c0_i32 = arith.constant 0 : i32
    %c0_i32_0 = arith.constant 0 : i32
    %c0_i32_1 = arith.constant 0 : i32
    return %c0_i32, %c0_i32_0 : i32, i32
  }
  func.func @transform_7(%arg0: i32) -> (i32, i32) {
    %c0_i32 = arith.constant 0 : i32
    %c0_i32_0 = arith.constant 0 : i32
    %c0_i32_1 = arith.constant 0 : i32
    return %c0_i32, %c0_i32_0 : i32, i32
  }
  func.func @transform_8(%arg0: i32) -> (i32, i32) {
    %c0_i32 = arith.constant 0 : i32
    %c0_i32_0 = arith.constant 0 : i32
    %c0_i32_1 = arith.constant 0 : i32
    return %c0_i32, %c0_i32_0 : i32, i32
  }
  func.func @transform_9(%arg0: i32) -> (i32, i32, i32) {
    %c0_i32 = arith.constant 0 : i32
    %c0_i32_0 = arith.constant 0 : i32
    %c0_i32_1 = arith.constant 0 : i32
    %c0_i32_2 = arith.constant 0 : i32
    return %c0_i32, %c0_i32_0, %c0_i32_1 : i32, i32, i32
  }
}

</mosaic_0001>

<bundles_post_ra>
// kernel: tpu_custom_call.1
= control target key start
LH: loop header
LB: loop body
LE: loop exit
PB: predicated region body
PF: predicated region fallthrough
CT: control target
= control target key end

     0   :  { %14 = vsyncpa [#allocation4], 0  ;;  %s4562_s0 = inlined_call_operand.hbm [shape: f32[16,16], index: 0, kind: input, shape index: {}]   ;;  %s4563_s1 = inlined_call_operand.hbm [shape: f32[16,128], index: 1, kind: input, shape index: {}]   ;;  %s4564_s2 = inlined_call_operand.vmem [shape: f32[1,128], index: 2, kind: input, shape index: {}]   ;;  %s4565_s3 = inlined_call_operand.vmem [shape: f32[32,128], index: 3, kind: input, shape index: {}]   ;;  %s4566_s4 = inlined_call_operand.hbm [shape: f32[32,128], index: 4, kind: input, shape index: {}]   ;;  %s4567_s5 = inlined_call_operand.vmem [shape: f32[1,128], index: 5, kind: input, shape index: {}]   ;;  %s4568_s6 = inlined_call_operand.vmem [shape: f32[32,128], index: 6, kind: input, shape index: {}]   ;;  %s4569_s7 = inlined_call_operand.vmem [shape: f32[32,16], index: 7, kind: input, shape index: {}]   ;;  %s4570_s8 = inlined_call_operand.vmem [shape: f32[1,16], index: 8, kind: input, shape index: {}]   ;;  %s4571_s9 = inlined_call_operand.hbm [shape: f32[8,2,16], index: 9, kind: output, shape index: {}]  }
   0x1   :  { %15 = vsyncpa [#allocation7], 0 }
   0x2   :  { %16 = vsyncpa [#allocation5], 0  ;;  %s3995_s30 = smov [#allocation6]   ;;  %s3996_s11 = smov [#allocation3]  }
   0x3   :  { %s34_s10 = sshll.u32 %s3995_s30, 4  ;;  %s22_s12 = sshll.u32 %s3996_s11, 4  ;;  %s35_s10 = int_to_ptr.vmem [resolvable:$true] %s34_s10  ;;  %s4057_s12 = int_to_ptr.vmem [resolvable:$true] %s22_s12 }
   0x4   :  { %s3901_s15 = scalar_lea.hbm %s4563_s1, 256 }
   0x5   :  { %p3902_p0 = scmp.ne.s32.totalorder %s4563_s1, %s3901_s15  ;;  %p3905_p1 = scmp.lt.u32.totalorder %s3901_s15, %s4563_s1 }
   0x7   :  { %p3907_p2 = pnand %p3905_p1, %p3902_p0 }
   0x9   :  { %3910 = shalt.err (!%p3907_p2)
}
   0xa   :  { %s3911_s20 = scalar_lea.vmem %s35_s10, 256  ;;  %p3916_p4 = scmp.lt.s32.totalorder %s35_s10, %s35_s10 }
   0xb   :  { %p3912_p3 = scmp.ne.s32.totalorder %s35_s10, %s3911_s20  ;;  %p3917_p5 = scmp.lt.s32.totalorder %s3911_s20, %s3911_s20 }
   0xd   :  { %p3918_p6 = por %p3917_p5, %p3916_p4 }
   0xf   :  { %p3919_p7 = pnand %p3918_p6, %p3912_p3 }
  0x11   :  { %3922 = shalt.err (!%p3919_p7)
}
  0x12   :  { %s3997_s21 = smov 128   ;;  %s3998_s22 = smov 8  }
  0x13   :  { %40 = dma.hbm_to_vmem [thread:$0]  %s4563_s1, 256, %s35_s10, [#allocation7], %s3997_s21, %s3997_s21, %s3998_s22  }
  0x14   :  { %s3923_s27 = scalar_lea.hbm %s4562_s0, 256 }
  0x15   :  { %p3924_p8 = scmp.ne.s32.totalorder %s4562_s0, %s3923_s27  ;;  %p3927_p9 = scmp.lt.u32.totalorder %s3923_s27, %s4562_s0 }
  0x17   :  { %p3929_p10 = pnand %p3927_p9, %p3924_p8 }
  0x19   :  { %3932 = shalt.err (!%p3929_p10)
}
  0x1a   :  { %s3933_s13 = scalar_lea.vmem %s4057_s12, 256  ;;  %p3938_p12 = scmp.lt.s32.totalorder %s4057_s12, %s4057_s12 }
  0x1b   :  { %p3934_p11 = scmp.ne.s32.totalorder %s4057_s12, %s3933_s13  ;;  %p3939_p13 = scmp.lt.s32.totalorder %s3933_s13, %s3933_s13 }
  0x1d   :  { %p3940_p0 = por %p3939_p13, %p3938_p12 }
  0x1f   :  { %p3941_p1 = pnand %p3940_p0, %p3934_p11 }
  0x21   :  { %3944 = shalt.err (!%p3941_p1)
}
  0x22   :  { %28 = dma.hbm_to_vmem [thread:$0]  %s4562_s0, 256, %s4057_s12, [#allocation4], %s3997_s21, %s3997_s21, %s3998_s22  }
  0x23   :  { %s3999_s14 = smov [#allocation8]   ;;  %s3945_s18 = scalar_lea.hbm %s4566_s4, 512 }
  0x24   :  { %s50_s15 = sshll.u32 %s3999_s14, 4  ;;  %p3946_p2 = scmp.ne.s32.totalorder %s4566_s4, %s3945_s18  ;;  %s51_s15 = int_to_ptr.vmem [resolvable:$true] %s50_s15 }
  0x25   :  { %p3949_p3 = scmp.lt.u32.totalorder %s3945_s18, %s4566_s4 }
  0x27   :  { %p3951_p4 = pnand %p3949_p3, %p3946_p2 }
  0x29   :  { %3954 = shalt.err (!%p3951_p4)
}
  0x2a   :  { %s3955_s25 = scalar_lea.vmem %s51_s15, 512  ;;  %p3960_p6 = scmp.lt.s32.totalorder %s51_s15, %s51_s15 }
  0x2b   :  { %p3956_p5 = scmp.ne.s32.totalorder %s51_s15, %s3955_s25  ;;  %p3961_p7 = scmp.lt.s32.totalorder %s3955_s25, %s3955_s25 }
  0x2d   :  { %p3962_p8 = por %p3961_p7, %p3960_p6 }
  0x2f   :  { %p3963_p9 = pnand %p3962_p8, %p3956_p5 }
  0x31   :  { %3966 = shalt.err (!%p3963_p9)
}
  0x32   :  { %56 = dma.hbm_to_vmem [thread:$0]  %s4566_s4, 512, %s51_s15, [#allocation7], %s3997_s21, %s3997_s21, %s3998_s22  }
  0x33   :  { %3989 = dma.done.wait [#allocation4], 256  }
  0x34   :  { %3990 = vsyncadd [#allocation4], 4294967040 }
  0x35   :  { %3991 = dma.done.wait [#allocation7], 768  }
  0x36   :  { %3992 = vsyncadd [#allocation7], 4294966528  ;;  %v4000_v0 = vmov 0.0|0.0   ;;  %vm4001_vm0 = vmmov 0   ;;  %v4002_v1 = vmov 0.0   ;;  %vm103_vm1 = vcmask 130048  }
  0x37   :  { %3543 = vmatprep.subr.bf16.mxu1 %v4000_v0  ;;  %3195 = vmatprep.mubr.msk.f32.mxu1 %vm4001_vm0, %v4002_v1  ;;  %v94_v2 = vld [vmem:[#allocation6] sm:$0xff]  ;;  %v95_v3 = vld [vmem:[#allocation6 + $0x8] sm:$0xff]  ;;  %v92_v4 = vld [vmem:[#allocation3] sm:$0xff]  ;;  %s4003_s13 = smov 64   ;;  %vm188_vm2 = vcmask 261120   ;;  %vm544_vm3 = vcmask 123904  }
  0x38   :  { %v3539_v5 = vpack.c.bf16 %v95_v3, %v94_v2  ;;  %3184 = vmatprep.mubr.msk.f32.mxu0 %vm103_vm1, %v92_v4  ;;  %v74_v6 = vld [vmem:[%s4565_s3] sm:$0xff]  ;;  %v75_v7 = vld [vmem:[%s4565_s3 + $0x8] sm:$0xff]  ;;  %v76_v9 = vld [vmem:[%s4565_s3 + $0x10] sm:$0xff] }
  0x39   :  { %v4119_v8 = vpack.c.bf16 %v75_v7, %v74_v6  ;;  %v77_v10 = vld [vmem:[%s4565_s3 + $0x18] sm:$0xff]  ;;  %v2965_v13 = vld [vmem:[%s4564_s2] ss:$0 sm:$0xff]  ;;  %s4004_s2 = smov 32   ;;  %v82_v32 = vld [vmem:[#allocation8] sm:$0xff] }
  0x3a   :  { %3540 = vmatprep.subr.bf16.mxu0 %v3539_v5  ;;  %v93_v11 = vld [vmem:[#allocation3 + $0x8] sm:$0xff]  ;;  %v4128_v12 = vpack.c.bf16 %v77_v10, %v76_v9  ;;  %v84_v34 = vld [vmem:[#allocation8 + $0x10] sm:$0xff]  ;;  %v85_v36 = vld [vmem:[#allocation8 + $0x18] sm:$0xff] }
  0x3b   :  { %3542 = vmatpush3.bf16.msra.mxu0 %v3539_v5  ;;  %3545 = vmatpush3.bf16.msra.mxu1 %v4119_v8  ;;  %v83_v33 = vld [vmem:[#allocation8 + $0x8] sm:$0xff]  ;;  %v4151_v37 = vpack.c.bf16 %v85_v36, %v84_v34  ;;  %v78_v41 = vld [vmem:[%s4568_s6] sm:$0xff]  ;;  %v79_v42 = vld [vmem:[%s4568_s6 + $0x8] sm:$0xff] }
  0x3c   :  { %3546 = vmatprep.subr.bf16.mxu1 %v4000_v0  ;;  %3549 = vmatprep.subr.bf16.mxu0 %v4000_v0  ;;  %v4148_v35 = vpack.c.bf16 %v83_v33, %v82_v32  ;;  %v4164_v43 = vpack.c.bf16 %v79_v42, %v78_v41  ;;  %v80_v44 = vld [vmem:[%s4568_s6 + $0x10] sm:$0xff]  ;;  %v81_v45 = vld [vmem:[%s4568_s6 + $0x18] sm:$0xff]  ;;  %v4191_v48 = vld [vmem:[%s4567_s5] ss:$0 sm:$0xff] }
  0x3d   :  { %v4174_v47 = vpack.c.bf16 %v81_v45, %v80_v44  ;;  %v87_v62 = vld [vmem:[%s4569_s7] sm:$0xff]  ;;  %v88_v63 = vld [vmem:[%s4569_s7 + $0x8] sm:$0xff]  ;;  %v89_v2 = vld [vmem:[%s4569_s7 + $0x10] sm:$0xff] }
  0x3e   :  { %3185 = vmatmul.mubr.msk.f32.vlgmr.msra.gmra.mrb[0].mxu0 %vm103_vm1, %v93_v11  ;;  %v4208_v3 = vpack.c.bf16 %v88_v63, %v87_v62  ;;  %v90_v4 = vld [vmem:[%s4569_s7 + $0x18] sm:$0xff]  ;;  %v4238_v11 = vld [vmem:[%s4570_s8] ss:$0 sm:$0xff] }
  0x3f   :  { %3548 = vmatpush3.bf16.msra.mxu1 %v4128_v12  ;;  %3206 = vmatprep.mubr.msk.f32.mxu0 %vm4001_vm0, %v4002_v1  ;;  %v4214_v5 = vpack.c.bf16 %v90_v4, %v89_v2 }
  0x40   :  { %3561 = vmatprep.subr.bf16.mxu1 %v4000_v0  ;;  %3551 = vmatpush3.bf16.msra.mxu0 %v4148_v35 }
  0x41   :  { %3552 = vmatprep.subr.bf16.mxu0 %v4000_v0 }
  0x42   :  { %3196 = vmatmul.mubr.f32.vlgmr.msra.gmra.mrb[0].mxu1 %v4002_v1 }
  0x43   :  { %3228 = vmatprep.mubr.msk.f32.mxu1 %vm4001_vm0, %v4002_v1  ;;  %3563 = vmatpush3.bf16.msra.mxu1 %v4208_v3 }
  0x44   :  { %3554 = vmatpush3.bf16.msra.mxu0 %v4151_v37  ;;  %3564 = vmatprep.subr.bf16.mxu1 %v4000_v0 }
  0x45   :  { %3555 = vmatprep.subr.bf16.mxu0 %v4000_v0 }
  0x47   :  { %3566 = vmatpush3.bf16.msra.mxu1 %v4214_v5 }
  0x48   :  { %3567 = vmatprep.subr.bf16.mxu1 %v4000_v0 }
 0x111   :  { %v3186_v14 = vpop.f32.mrb[0].mxu0 }
 0x112   :  { %v182_v15 = vadd.f32 %v3186_v14, %v2965_v13  ;;  %v176_v16 = vpop.f32.mrb[1].mxu0 }
 0x113   :  { %v177_v17 = vadd.f32 %v2965_v13, %v176_v16 }
 0x114   :  { %186 = vst [vmem:[#allocation2 + $0x8] sm:$0xff] %v182_v15 }
 0x115   :  { %185 = vst [vmem:[#allocation2] sm:$0xff] %v177_v17  ;;  %v258_v18 = vpop.f32.mrb[0].mxu1 }
 0x116   :  { %v3197_v19 = vpop.f32.mrb[1].mxu1 }
 0x11c   :  { %v187_v20 = vld [vmem:[#allocation2] sm:$0x3]  ;;  %v546_v16 = vld [vmem:[#allocation2 + $0x2] sm:$0x3] }
 0x11d   :  { %v262_v21 = vadd.f32 %v258_v18, %v187_v20 }
 0x11f   :  { %3771 = vtanh.f32 %v262_v21  ;;  %v2968_v23 = vmul.f32 -1.442695, %v262_v21 }
 0x121   :  { %3773 = vpow2.f32 %v2968_v23 }
 0x129   :  { %v3772_v22 = vpop.eup %3771 }
 0x12a   :  { %272 = vrot.lane.b32.xlu0 %v3772_v22, %s4003_s13 }
 0x12b   :  { %v3774_v24 = vpop.eup %3773 }
 0x12c   :  { %v266_v25 = vadd.f32 1.0, %v3774_v24 }
 0x12e   :  { %3775 = vrcp.f32 %v266_v25 }
 0x138   :  { %v3776_v26 = vpop.eup %3775 }
 0x139   :  { %v270_v29 = vmul.f32 0.0, %v3776_v26 }
 0x19c   :  { %v273_v27 = vpop.permute.xlu0 %272 }
 0x19d   :  { %v275_v28 = vmul.f32 %v3776_v26, %v273_v27 }
 0x19f   :  { %277 = vrot.lane.b32.xlu0 %v275_v28, %s4004_s2 }
 0x211   :  { %v278_v30 = vpop.permute.xlu0 %277 }
 0x212   :  { %v4145_v31 = vadd.f32 %v278_v30, %v270_v29 }
 0x214   :  { %3777 = vtanh.f32 %v4145_v31 }
 0x21e   :  { %v3778_v38 = vpop.eup %3777 }
 0x21f   :  { %283 = vrot.lane.b32.xlu1 %v3778_v38, %s4003_s13 }
 0x291   :  { %v284_v39 = vpop.permute.xlu1 %283 }
 0x292   :  { %v286_v40 = vmul.f32 %v3776_v26, %v284_v39 }
 0x294   :  { %294 = vrot.lane.b32.xlu1 %v286_v40, %s4004_s2 }
 0x306   :  { %v295_v46 = vpop.permute.xlu1 %294 }
 0x307   :  { %3207 = vmatmul.mubr.msk.f32.vlgmr.msra.gmra.mrb[2].mxu0 %vm188_vm2, %v295_v46 }
 0x308   :  { %3557 = vmatpush3.bf16.msra.mxu0 %v4164_v43  ;;  %3217 = vmatprep.mubr.msk.f32.mxu0 %vm4001_vm0, %v4002_v1 }
 0x309   :  { %3558 = vmatprep.subr.bf16.mxu0 %v4000_v0 }
 0x30c   :  { %3560 = vmatpush3.bf16.msra.mxu0 %v4174_v47 }
 0x30d   :  { %3573 = vmatprep.subr.bf16.mxu0 %v4000_v0 }
 0x30f   :  { %3218 = vmatmul.mubr.f32.vlgmr.msra.gmra.mrb[2].mxu0 %v4002_v1 }
 0x310   :  { %3575 = vmatpush3.bf16.msra.mxu0 %v4148_v35  ;;  %3250 = vmatprep.mubr.msk.f32.mxu0 %vm4001_vm0, %v4002_v1 }
 0x311   :  { %3576 = vmatprep.subr.bf16.mxu0 %v4000_v0 }
 0x314   :  { %3578 = vmatpush3.bf16.msra.mxu0 %v4151_v37 }
 0x315   :  { %3579 = vmatprep.subr.bf16.mxu0 %v4000_v0 }
 0x3e2   :  { %v434_v49 = vpop.f32.mrb[2].mxu0 }
 0x3e3   :  { %v3735_v50 = vadd.f32 %v4191_v48, %v434_v49  ;;  %v3219_v51 = vpop.f32.mrb[3].mxu0 }
 0x3e5   :  { %3779 = vtanh.f32 %v3735_v50  ;;  %v2971_v53 = vmul.f32 -1.442695, %v3735_v50 }
 0x3e7   :  { %3781 = vpow2.f32 %v2971_v53 }
 0x3ef   :  { %v3780_v52 = vpop.eup %3779 }
 0x3f0   :  { %448 = vrot.lane.b32.xlu0 %v3780_v52, %s4003_s13 }
 0x3f1   :  { %v3782_v54 = vpop.eup %3781 }
 0x3f2   :  { %v442_v55 = vadd.f32 1.0, %v3782_v54 }
 0x3f4   :  { %3783 = vrcp.f32 %v442_v55 }
 0x3fe   :  { %v3784_v56 = vpop.eup %3783 }
 0x3ff   :  { %v446_v59 = vmul.f32 0.0, %v3784_v56 }
 0x462   :  { %v449_v57 = vpop.permute.xlu0 %448 }
 0x463   :  { %v451_v58 = vmul.f32 %v3784_v56, %v449_v57 }
 0x465   :  { %453 = vrot.lane.b32.xlu1 %v451_v58, %s4004_s2 }
 0x4d7   :  { %v454_v60 = vpop.permute.xlu1 %453 }
 0x4d8   :  { %v4196_v61 = vadd.f32 %v454_v60, %v446_v59  ;;  %v889_v59 = vld [vmem:[#allocation2 + $0x4] sm:$0x3] }
 0x4da   :  { %3785 = vtanh.f32 %v4196_v61 }
 0x4e4   :  { %v3786_v6 = vpop.eup %3785 }
 0x4e5   :  { %459 = vrot.lane.b32.xlu0 %v3786_v6, %s4003_s13 }
 0x557   :  { %v460_v7 = vpop.permute.xlu0 %459 }
 0x558   :  { %v462_v9 = vmul.f32 %v3784_v56, %v460_v7 }
 0x55a   :  { %470 = vrot.lane.b32.xlu1 %v462_v9, %s4004_s2 }
 0x5cc   :  { %v471_v10 = vpop.permute.xlu1 %470 }
 0x5cd   :  { %3229 = vmatmul.mubr.msk.f32.vlgmr.msra.gmra.mrb[2].mxu1 %vm188_vm2, %v471_v10 }
 0x5ce   :  { %3569 = vmatpush3.bf16.msra.mxu1 %v4119_v8  ;;  %3239 = vmatprep.mubr.msk.f32.mxu1 %vm4001_vm0, %v4002_v1 }
 0x5cf   :  { %3570 = vmatprep.subr.bf16.mxu1 %v4000_v0 }
 0x5d2   :  { %3572 = vmatpush3.bf16.msra.mxu1 %v4128_v12 }
 0x5d3   :  { %3585 = vmatprep.subr.bf16.mxu1 %v4000_v0 }
 0x5d5   :  { %3240 = vmatmul.mubr.msk.f32.vlgmr.msra.gmra.mrb[4].mxu1 %vm188_vm2, %v295_v46 }
 0x5d6   :  { %3587 = vmatpush3.bf16.msra.mxu1 %v4208_v3  ;;  %3272 = vmatprep.mubr.msk.f32.mxu1 %vm4001_vm0, %v4002_v1 }
 0x5d7   :  { %3588 = vmatprep.subr.bf16.mxu1 %v4000_v0 }
 0x5da   :  { %3590 = vmatpush3.bf16.msra.mxu1 %v4214_v5 }
 0x5db   :  { %3591 = vmatprep.subr.bf16.mxu1 %v4000_v0 }
 0x6a0   :  { %v540_v13 = vpop.f32.mrb[2].mxu1 }
 0x6a1   :  { %v541_v14 = vadd.f32 %v4238_v11, %v540_v13  ;;  %v3230_v15 = vpop.f32.mrb[3].mxu1 }
 0x6a3   :  { %545 = vst.msk [vmem:[#allocation9] sm:$0x3] %vm544_vm3, %v541_v14 }
 0x6a8   :  { %v613_v17 = vpop.f32.mrb[4].mxu1 }
 0x6a9   :  { %v617_v18 = vadd.f32 %v613_v17, %v546_v16  ;;  %v3241_v19 = vpop.f32.mrb[5].mxu1 }
 0x6ab   :  { %3787 = vtanh.f32 %v617_v18  ;;  %v2975_v21 = vmul.f32 -1.442695, %v617_v18 }
 0x6ad   :  { %3789 = vpow2.f32 %v2975_v21 }
 0x6b5   :  { %v3788_v20 = vpop.eup %3787 }
 0x6b6   :  { %627 = vrot.lane.b32.xlu0 %v3788_v20, %s4003_s13 }
 0x6b7   :  { %v3790_v22 = vpop.eup %3789 }
 0x6b8   :  { %v621_v23 = vadd.f32 1.0, %v3790_v22 }
 0x6ba   :  { %3791 = vrcp.f32 %v621_v23 }
 0x6c4   :  { %v3792_v24 = vpop.eup %3791 }
 0x6c5   :  { %v625_v27 = vmul.f32 %v3792_v24, %v4145_v31 }
 0x728   :  { %v628_v25 = vpop.permute.xlu0 %627 }
 0x729   :  { %v630_v26 = vmul.f32 %v3792_v24, %v628_v25 }
 0x72b   :  { %632 = vrot.lane.b32.xlu1 %v630_v26, %s4004_s2 }
 0x79d   :  { %v633_v28 = vpop.permute.xlu1 %632 }
 0x79e   :  { %v4245_v29 = vadd.f32 %v633_v28, %v625_v27 }
 0x7a0   :  { %3793 = vtanh.f32 %v4245_v29 }
 0x7aa   :  { %v3794_v30 = vpop.eup %3793 }
 0x7ab   :  { %638 = vrot.lane.b32.xlu0 %v3794_v30, %s4003_s13 }
 0x81d   :  { %v639_v32 = vpop.permute.xlu0 %638 }
 0x81e   :  { %v641_v33 = vmul.f32 %v3792_v24, %v639_v32 }
 0x820   :  { %643 = vrot.lane.b32.xlu1 %v641_v33, %s4004_s2 }
 0x892   :  { %v644_v34 = vpop.permute.xlu1 %643 }
 0x893   :  { %3251 = vmatmul.mubr.msk.f32.vlgmr.msra.gmra.mrb[4].mxu0 %vm188_vm2, %v644_v34 }
 0x894   :  { %3581 = vmatpush3.bf16.msra.mxu0 %v4164_v43  ;;  %3261 = vmatprep.mubr.msk.f32.mxu0 %vm4001_vm0, %v4002_v1 }
 0x895   :  { %3582 = vmatprep.subr.bf16.mxu0 %v4000_v0 }
 0x898   :  { %3584 = vmatpush3.bf16.msra.mxu0 %v4174_v47 }
 0x899   :  { %3597 = vmatprep.subr.bf16.mxu0 %v4000_v0 }
 0x89b   :  { %3262 = vmatmul.mubr.msk.f32.vlgmr.msra.gmra.mrb[4].mxu0 %vm188_vm2, %v471_v10 }
 0x89c   :  { %3599 = vmatpush3.bf16.msra.mxu0 %v4148_v35  ;;  %3294 = vmatprep.mubr.msk.f32.mxu0 %vm4001_vm0, %v4002_v1 }
 0x89d   :  { %3600 = vmatprep.subr.bf16.mxu0 %v4000_v0 }
 0x8a0   :  { %3602 = vmatpush3.bf16.msra.mxu0 %v4151_v37 }
 0x8a1   :  { %3603 = vmatprep.subr.bf16.mxu0 %v4000_v0 }
 0x96e   :  { %v783_v31 = vpop.f32.mrb[4].mxu0 }
 0x96f   :  { %v3736_v36 = vadd.f32 %v4191_v48, %v783_v31  ;;  %v3263_v38 = vpop.f32.mrb[5].mxu0 }
 0x971   :  { %3795 = vtanh.f32 %v3736_v36  ;;  %v2978_v40 = vmul.f32 -1.442695, %v3736_v36 }
 0x973   :  { %3797 = vpow2.f32 %v2978_v40 }
 0x97b   :  { %v3796_v39 = vpop.eup %3795 }
 0x97c   :  { %797 = vrot.lane.b32.xlu0 %v3796_v39, %s4003_s13 }
 0x97d   :  { %v3798_v41 = vpop.eup %3797 }
 0x97e   :  { %v791_v42 = vadd.f32 1.0, %v3798_v41 }
 0x980   :  { %3799 = vrcp.f32 %v791_v42  ;;  %v1232_v42 = vld [vmem:[#allocation2 + $0x6] sm:$0x3] }
 0x98a   :  { %v3800_v44 = vpop.eup %3799 }
 0x98b   :  { %v795_v49 = vmul.f32 %v3800_v44, %v4196_v61 }
 0x9ee   :  { %v798_v45 = vpop.permute.xlu0 %797 }
 0x9ef   :  { %v800_v46 = vmul.f32 %v3800_v44, %v798_v45 }
 0x9f1   :  { %802 = vrot.lane.b32.xlu1 %v800_v46, %s4004_s2 }
 0xa63   :  { %v803_v50 = vpop.permute.xlu1 %802 }
 0xa64   :  { %v4268_v51 = vadd.f32 %v803_v50, %v795_v49 }
 0xa66   :  { %3801 = vtanh.f32 %v4268_v51 }
 0xa70   :  { %v3802_v52 = vpop.eup %3801 }
 0xa71   :  { %808 = vrot.lane.b32.xlu0 %v3802_v52, %s4003_s13 }
 0xae3   :  { %v809_v53 = vpop.permute.xlu0 %808 }
 0xae4   :  { %v811_v54 = vmul.f32 %v3800_v44, %v809_v53 }
 0xae6   :  { %813 = vrot.lane.b32.xlu1 %v811_v54, %s4004_s2 }
 0xb58   :  { %v814_v55 = vpop.permute.xlu1 %813 }
 0xb59   :  { %3273 = vmatmul.mubr.msk.f32.vlgmr.msra.gmra.mrb[6].mxu1 %vm188_vm2, %v814_v55 }
 0xb5a   :  { %3593 = vmatpush3.bf16.msra.mxu1 %v4119_v8  ;;  %3283 = vmatprep.mubr.msk.f32.mxu1 %vm4001_vm0, %v4002_v1 }
 0xb5b   :  { %3594 = vmatprep.subr.bf16.mxu1 %v4000_v0 }
 0xb5e   :  { %3596 = vmatpush3.bf16.msra.mxu1 %v4128_v12 }
 0xb5f   :  { %3609 = vmatprep.subr.bf16.mxu1 %v4000_v0 }
 0xb61   :  { %3284 = vmatmul.mubr.msk.f32.vlgmr.msra.gmra.mrb[8].mxu1 %vm188_vm2, %v644_v34 }
 0xb62   :  { %3611 = vmatpush3.bf16.msra.mxu1 %v4208_v3  ;;  %3316 = vmatprep.mubr.msk.f32.mxu1 %vm4001_vm0, %v4002_v1 }
 0xb63   :  { %3612 = vmatprep.subr.bf16.mxu1 %v4000_v0 }
 0xb66   :  { %3614 = vmatpush3.bf16.msra.mxu1 %v4214_v5 }
 0xb67   :  { %3615 = vmatprep.subr.bf16.mxu1 %v4000_v0 }
 0xc2c   :  { %v883_v56 = vpop.f32.mrb[6].mxu1 }
 0xc2d   :  { %v884_v57 = vadd.f32 %v4238_v11, %v883_v56  ;;  %v3274_v58 = vpop.f32.mrb[7].mxu1 }
 0xc2f   :  { %888 = vst.msk [vmem:[#allocation9 + $0x2] sm:$0x3] %vm544_vm3, %v884_v57 }
 0xc34   :  { %v956_v60 = vpop.f32.mrb[8].mxu1 }
 0xc35   :  { %v960_v61 = vadd.f32 %v956_v60, %v889_v59  ;;  %v3285_v62 = vpop.f32.mrb[9].mxu1 }
 0xc37   :  { %3803 = vtanh.f32 %v960_v61  ;;  %v2981_v2 = vmul.f32 -1.442695, %v960_v61 }
 0xc39   :  { %3805 = vpow2.f32 %v2981_v2 }
 0xc41   :  { %v3804_v63 = vpop.eup %3803 }
 0xc42   :  { %970 = vrot.lane.b32.xlu0 %v3804_v63, %s4003_s13 }
 0xc43   :  { %v3806_v4 = vpop.eup %3805 }
 0xc44   :  { %v964_v6 = vadd.f32 1.0, %v3806_v4 }
 0xc46   :  { %3807 = vrcp.f32 %v964_v6 }
 0xc50   :  { %v3808_v7 = vpop.eup %3807 }
 0xc51   :  { %v968_v13 = vmul.f32 %v3808_v7, %v4245_v29 }
 0xcb4   :  { %v971_v9 = vpop.permute.xlu0 %970 }
 0xcb5   :  { %v973_v10 = vmul.f32 %v3808_v7, %v971_v9 }
 0xcb7   :  { %975 = vrot.lane.b32.xlu1 %v973_v10, %s4004_s2 }
 0xd29   :  { %v976_v14 = vpop.permute.xlu1 %975 }
 0xd2a   :  { %v4292_v15 = vadd.f32 %v976_v14, %v968_v13 }
 0xd2c   :  { %3809 = vtanh.f32 %v4292_v15 }
 0xd36   :  { %v3810_v16 = vpop.eup %3809 }
 0xd37   :  { %981 = vrot.lane.b32.xlu0 %v3810_v16, %s4003_s13 }
 0xda9   :  { %v982_v17 = vpop.permute.xlu0 %981 }
 0xdaa   :  { %v984_v18 = vmul.f32 %v3808_v7, %v982_v17 }
 0xdac   :  { %986 = vrot.lane.b32.xlu1 %v984_v18, %s4004_s2 }
 0xe1e   :  { %v987_v19 = vpop.permute.xlu1 %986 }
 0xe1f   :  { %3295 = vmatmul.mubr.msk.f32.vlgmr.msra.gmra.mrb[6].mxu0 %vm188_vm2, %v987_v19 }
 0xe20   :  { %3605 = vmatpush3.bf16.msra.mxu0 %v4164_v43  ;;  %3305 = vmatprep.mubr.msk.f32.mxu0 %vm4001_vm0, %v4002_v1 }
 0xe21   :  { %3606 = vmatprep.subr.bf16.mxu0 %v4000_v0 }
 0xe24   :  { %3608 = vmatpush3.bf16.msra.mxu0 %v4174_v47 }
 0xe25   :  { %3621 = vmatprep.subr.bf16.mxu0 %v4000_v0 }
 0xe27   :  { %3306 = vmatmul.mubr.msk.f32.vlgmr.msra.gmra.mrb[6].mxu0 %vm188_vm2, %v814_v55 }
 0xe28   :  { %3623 = vmatpush3.bf16.msra.mxu0 %v4148_v35  ;;  %3338 = vmatprep.mubr.msk.f32.mxu0 %vm4001_vm0, %v4002_v1 }
 0xe29   :  { %3624 = vmatprep.subr.bf16.mxu0 %v4000_v0 }
 0xe2c   :  { %3626 = vmatpush3.bf16.msra.mxu0 %v4151_v37 }
 0xe2d   :  { %3627 = vmatprep.subr.bf16.mxu0 %v4000_v0 }
 0xefa   :  { %v1126_v20 = vpop.f32.mrb[6].mxu0 }
 0xefb   :  { %v3737_v21 = vadd.f32 %v4191_v48, %v1126_v20  ;;  %v3307_v22 = vpop.f32.mrb[7].mxu0 }
 0xefd   :  { %3811 = vtanh.f32 %v3737_v21  ;;  %v2984_v24 = vmul.f32 -1.442695, %v3737_v21 }
 0xeff   :  { %3813 = vpow2.f32 %v2984_v24 }
 0xf07   :  { %v3812_v23 = vpop.eup %3811 }
 0xf08   :  { %1140 = vrot.lane.b32.xlu0 %v3812_v23, %s4003_s13 }
 0xf09   :  { %v3814_v25 = vpop.eup %3813 }
 0xf0a   :  { %v1134_v26 = vadd.f32 1.0, %v3814_v25 }
 0xf0c   :  { %3815 = vrcp.f32 %v1134_v26  ;;  %v1575_v26 = vld [vmem:[#allocation2 + $0x8] sm:$0x3] }
 0xf16   :  { %v3816_v27 = vpop.eup %3815 }
 0xf17   :  { %v1138_v30 = vmul.f32 %v3816_v27, %v4268_v51 }
 0xf7a   :  { %v1141_v28 = vpop.permute.xlu0 %1140 }
 0xf7b   :  { %v1143_v29 = vmul.f32 %v3816_v27, %v1141_v28 }
 0xf7d   :  { %1145 = vrot.lane.b32.xlu1 %v1143_v29, %s4004_s2 }
 0xfef   :  { %v1146_v32 = vpop.permute.xlu1 %1145 }
 0xff0   :  { %v4315_v33 = vadd.f32 %v1146_v32, %v1138_v30 }
 0xff2   :  { %3817 = vtanh.f32 %v4315_v33 }
 0xffc   :  { %v3818_v34 = vpop.eup %3817 }
 0xffd   :  { %1151 = vrot.lane.b32.xlu0 %v3818_v34, %s4003_s13 }
0x106f   :  { %v1152_v31 = vpop.permute.xlu0 %1151 }
0x1070   :  { %v1154_v36 = vmul.f32 %v3816_v27, %v1152_v31 }
0x1072   :  { %1156 = vrot.lane.b32.xlu1 %v1154_v36, %s4004_s2 }
0x10e4   :  { %v1157_v38 = vpop.permute.xlu1 %1156 }
0x10e5   :  { %3317 = vmatmul.mubr.msk.f32.vlgmr.msra.gmra.mrb[10].mxu1 %vm188_vm2, %v1157_v38 }
0x10e6   :  { %3617 = vmatpush3.bf16.msra.mxu1 %v4119_v8  ;;  %3327 = vmatprep.mubr.msk.f32.mxu1 %vm4001_vm0, %v4002_v1 }
0x10e7   :  { %3618 = vmatprep.subr.bf16.mxu1 %v4000_v0 }
0x10ea   :  { %3620 = vmatpush3.bf16.msra.mxu1 %v4128_v12 }
0x10eb   :  { %3633 = vmatprep.subr.bf16.mxu1 %v4000_v0 }
0x10ed   :  { %3328 = vmatmul.mubr.msk.f32.vlgmr.msra.gmra.mrb[12].mxu1 %vm188_vm2, %v987_v19 }
0x10ee   :  { %3635 = vmatpush3.bf16.msra.mxu1 %v4208_v3  ;;  %3360 = vmatprep.mubr.msk.f32.mxu1 %vm4001_vm0, %v4002_v1 }
0x10ef   :  { %3636 = vmatprep.subr.bf16.mxu1 %v4000_v0 }
0x10f2   :  { %3638 = vmatpush3.bf16.msra.mxu1 %v4214_v5 }
0x10f3   :  { %3639 = vmatprep.subr.bf16.mxu1 %v4000_v0 }
0x11b8   :  { %v1226_v39 = vpop.f32.mrb[10].mxu1 }
0x11b9   :  { %v1227_v40 = vadd.f32 %v4238_v11, %v1226_v39  ;;  %v3318_v41 = vpop.f32.mrb[11].mxu1 }
0x11bb   :  { %1231 = vst.msk [vmem:[#allocation9 + $0x4] sm:$0x3] %vm544_vm3, %v1227_v40 }
0x11c0   :  { %v1299_v44 = vpop.f32.mrb[12].mxu1 }
0x11c1   :  { %v1303_v45 = vadd.f32 %v1299_v44, %v1232_v42  ;;  %v3329_v46 = vpop.f32.mrb[13].mxu1 }
0x11c3   :  { %3819 = vtanh.f32 %v1303_v45  ;;  %v2987_v50 = vmul.f32 -1.442695, %v1303_v45 }
0x11c5   :  { %3821 = vpow2.f32 %v2987_v50 }
0x11cd   :  { %v3820_v49 = vpop.eup %3819 }
0x11ce   :  { %1313 = vrot.lane.b32.xlu0 %v3820_v49, %s4003_s13 }
0x11cf   :  { %v3822_v51 = vpop.eup %3821 }
0x11d0   :  { %v1307_v52 = vadd.f32 1.0, %v3822_v51 }
0x11d2   :  { %3823 = vrcp.f32 %v1307_v52 }
0x11dc   :  { %v3824_v53 = vpop.eup %3823 }
0x11dd   :  { %v1311_v56 = vmul.f32 %v3824_v53, %v4292_v15 }
0x1240   :  { %v1314_v54 = vpop.permute.xlu0 %1313 }
0x1241   :  { %v1316_v55 = vmul.f32 %v3824_v53, %v1314_v54 }
0x1243   :  { %1318 = vrot.lane.b32.xlu1 %v1316_v55, %s4004_s2 }
0x12b5   :  { %v1319_v57 = vpop.permute.xlu1 %1318 }
0x12b6   :  { %v4339_v58 = vadd.f32 %v1319_v57, %v1311_v56 }
0x12b8   :  { %3825 = vtanh.f32 %v4339_v58 }
0x12c2   :  { %v3826_v59 = vpop.eup %3825 }
0x12c3   :  { %1324 = vrot.lane.b32.xlu0 %v3826_v59, %s4003_s13 }
0x1335   :  { %v1325_v60 = vpop.permute.xlu0 %1324 }
0x1336   :  { %v1327_v61 = vmul.f32 %v3824_v53, %v1325_v60 }
0x1338   :  { %1329 = vrot.lane.b32.xlu1 %v1327_v61, %s4004_s2 }
0x13aa   :  { %v1330_v62 = vpop.permute.xlu1 %1329 }
0x13ab   :  { %3339 = vmatmul.mubr.msk.f32.vlgmr.msra.gmra.mrb[8].mxu0 %vm188_vm2, %v1330_v62 }
0x13ac   :  { %3629 = vmatpush3.bf16.msra.mxu0 %v4164_v43  ;;  %3349 = vmatprep.mubr.msk.f32.mxu0 %vm4001_vm0, %v4002_v1 }
0x13ad   :  { %3630 = vmatprep.subr.bf16.mxu0 %v4000_v0 }
0x13b0   :  { %3632 = vmatpush3.bf16.msra.mxu0 %v4174_v47 }
0x13b1   :  { %3645 = vmatprep.subr.bf16.mxu0 %v4000_v0 }
0x13b3   :  { %3350 = vmatmul.mubr.msk.f32.vlgmr.msra.gmra.mrb[8].mxu0 %vm188_vm2, %v1157_v38 }
0x13b4   :  { %3647 = vmatpush3.bf16.msra.mxu0 %v4148_v35  ;;  %3382 = vmatprep.mubr.msk.f32.mxu0 %vm4001_vm0, %v4002_v1 }
0x13b5   :  { %3648 = vmatprep.subr.bf16.mxu0 %v4000_v0 }
0x13b8   :  { %3650 = vmatpush3.bf16.msra.mxu0 %v4151_v37 }
0x13b9   :  { %3651 = vmatprep.subr.bf16.mxu0 %v4000_v0 }
0x1486   :  { %v1469_v63 = vpop.f32.mrb[8].mxu0 }
0x1487   :  { %v3738_v2 = vadd.f32 %v4191_v48, %v1469_v63  ;;  %v3351_v4 = vpop.f32.mrb[9].mxu0 }
0x1489   :  { %3827 = vtanh.f32 %v3738_v2  ;;  %v2990_v7 = vmul.f32 -1.442695, %v3738_v2 }
0x148b   :  { %3829 = vpow2.f32 %v2990_v7 }
0x1493   :  { %v3828_v6 = vpop.eup %3827 }
0x1494   :  { %1483 = vrot.lane.b32.xlu0 %v3828_v6, %s4003_s13 }
0x1495   :  { %v3830_v9 = vpop.eup %3829 }
0x1496   :  { %v1477_v10 = vadd.f32 1.0, %v3830_v9 }
0x1498   :  { %3831 = vrcp.f32 %v1477_v10  ;;  %v1918_v10 = vld [vmem:[#allocation2 + $0xa] sm:$0x3] }
0x14a2   :  { %v3832_v13 = vpop.eup %3831 }
0x14a3   :  { %v1481_v16 = vmul.f32 %v3832_v13, %v4315_v33 }
0x1506   :  { %v1484_v14 = vpop.permute.xlu0 %1483 }
0x1507   :  { %v1486_v15 = vmul.f32 %v3832_v13, %v1484_v14 }
0x1509   :  { %1488 = vrot.lane.b32.xlu1 %v1486_v15, %s4004_s2 }
0x157b   :  { %v1489_v17 = vpop.permute.xlu1 %1488 }
0x157c   :  { %v4362_v18 = vadd.f32 %v1489_v17, %v1481_v16 }
0x157e   :  { %3833 = vtanh.f32 %v4362_v18 }
0x1588   :  { %v3834_v19 = vpop.eup %3833 }
0x1589   :  { %1494 = vrot.lane.b32.xlu0 %v3834_v19, %s4003_s13 }
0x15fb   :  { %v1495_v20 = vpop.permute.xlu0 %1494 }
0x15fc   :  { %v1497_v21 = vmul.f32 %v3832_v13, %v1495_v20 }
0x15fe   :  { %1499 = vrot.lane.b32.xlu1 %v1497_v21, %s4004_s2 }
0x1670   :  { %v1500_v22 = vpop.permute.xlu1 %1499 }
0x1671   :  { %3361 = vmatmul.mubr.msk.f32.vlgmr.msra.gmra.mrb[14].mxu1 %vm188_vm2, %v1500_v22 }
0x1672   :  { %3641 = vmatpush3.bf16.msra.mxu1 %v4119_v8  ;;  %3371 = vmatprep.mubr.msk.f32.mxu1 %vm4001_vm0, %v4002_v1 }
0x1673   :  { %3642 = vmatprep.subr.bf16.mxu1 %v4000_v0 }
0x1676   :  { %3644 = vmatpush3.bf16.msra.mxu1 %v4128_v12 }
0x1677   :  { %3657 = vmatprep.subr.bf16.mxu1 %v4000_v0 }
0x1679   :  { %3372 = vmatmul.mubr.msk.f32.vlgmr.msra.gmra.mrb[16].mxu1 %vm188_vm2, %v1330_v62 }
0x167a   :  { %3659 = vmatpush3.bf16.msra.mxu1 %v4208_v3  ;;  %3404 = vmatprep.mubr.msk.f32.mxu1 %vm4001_vm0, %v4002_v1 }
0x167b   :  { %3660 = vmatprep.subr.bf16.mxu1 %v4000_v0 }
0x167e   :  { %3662 = vmatpush3.bf16.msra.mxu1 %v4214_v5 }
0x167f   :  { %3663 = vmatprep.subr.bf16.mxu1 %v4000_v0 }
0x1744   :  { %v1569_v23 = vpop.f32.mrb[14].mxu1 }
0x1745   :  { %v1570_v24 = vadd.f32 %v4238_v11, %v1569_v23  ;;  %v3362_v25 = vpop.f32.mrb[15].mxu1 }
0x1747   :  { %1574 = vst.msk [vmem:[#allocation9 + $0x6] sm:$0x3] %vm544_vm3, %v1570_v24 }
0x174c   :  { %v1642_v27 = vpop.f32.mrb[16].mxu1 }
0x174d   :  { %v1646_v28 = vadd.f32 %v1642_v27, %v1575_v26  ;;  %v3373_v29 = vpop.f32.mrb[17].mxu1 }
0x174f   :  { %3835 = vtanh.f32 %v1646_v28  ;;  %v2993_v32 = vmul.f32 -1.442695, %v1646_v28 }
0x1751   :  { %3837 = vpow2.f32 %v2993_v32 }
0x1759   :  { %v3836_v30 = vpop.eup %3835 }
0x175a   :  { %1656 = vrot.lane.b32.xlu0 %v3836_v30, %s4003_s13 }
0x175b   :  { %v3838_v33 = vpop.eup %3837 }
0x175c   :  { %v1650_v34 = vadd.f32 1.0, %v3838_v33 }
0x175e   :  { %3839 = vrcp.f32 %v1650_v34 }
0x1768   :  { %v3840_v31 = vpop.eup %3839 }
0x1769   :  { %v1654_v39 = vmul.f32 %v3840_v31, %v4339_v58 }
0x17cc   :  { %v1657_v36 = vpop.permute.xlu0 %1656 }
0x17cd   :  { %v1659_v38 = vmul.f32 %v3840_v31, %v1657_v36 }
0x17cf   :  { %1661 = vrot.lane.b32.xlu1 %v1659_v38, %s4004_s2 }
0x1841   :  { %v1662_v40 = vpop.permute.xlu1 %1661 }
0x1842   :  { %v4386_v41 = vadd.f32 %v1662_v40, %v1654_v39 }
0x1844   :  { %3841 = vtanh.f32 %v4386_v41 }
0x184e   :  { %v3842_v42 = vpop.eup %3841 }
0x184f   :  { %1667 = vrot.lane.b32.xlu0 %v3842_v42, %s4003_s13 }
0x18c1   :  { %v1668_v44 = vpop.permute.xlu0 %1667 }
0x18c2   :  { %v1670_v45 = vmul.f32 %v3840_v31, %v1668_v44 }
0x18c4   :  { %1672 = vrot.lane.b32.xlu1 %v1670_v45, %s4004_s2 }
0x1936   :  { %v1673_v46 = vpop.permute.xlu1 %1672 }
0x1937   :  { %3383 = vmatmul.mubr.msk.f32.vlgmr.msra.gmra.mrb[10].mxu0 %vm188_vm2, %v1673_v46 }
0x1938   :  { %3653 = vmatpush3.bf16.msra.mxu0 %v4164_v43  ;;  %3393 = vmatprep.mubr.msk.f32.mxu0 %vm4001_vm0, %v4002_v1 }
0x1939   :  { %3654 = vmatprep.subr.bf16.mxu0 %v4000_v0 }
0x193c   :  { %3656 = vmatpush3.bf16.msra.mxu0 %v4174_v47 }
0x193d   :  { %3669 = vmatprep.subr.bf16.mxu0 %v4000_v0 }
0x193f   :  { %3394 = vmatmul.mubr.msk.f32.vlgmr.msra.gmra.mrb[10].mxu0 %vm188_vm2, %v1500_v22 }
0x1940   :  { %3671 = vmatpush3.bf16.msra.mxu0 %v4148_v35  ;;  %3426 = vmatprep.mubr.msk.f32.mxu0 %vm4001_vm0, %v4002_v1 }
0x1941   :  { %3672 = vmatprep.subr.bf16.mxu0 %v4000_v0 }
0x1944   :  { %3674 = vmatpush3.bf16.msra.mxu0 %v4151_v37 }
0x1945   :  { %3675 = vmatprep.subr.bf16.mxu0 %v4000_v0 }
0x1a12   :  { %v1812_v49 = vpop.f32.mrb[10].mxu0 }
0x1a13   :  { %v3739_v50 = vadd.f32 %v4191_v48, %v1812_v49  ;;  %v3395_v51 = vpop.f32.mrb[11].mxu0 }
0x1a15   :  { %3843 = vtanh.f32 %v3739_v50  ;;  %v2996_v53 = vmul.f32 -1.442695, %v3739_v50 }
0x1a17   :  { %3845 = vpow2.f32 %v2996_v53 }
0x1a1f   :  { %v3844_v52 = vpop.eup %3843 }
0x1a20   :  { %1826 = vrot.lane.b32.xlu0 %v3844_v52, %s4003_s13 }
0x1a21   :  { %v3846_v54 = vpop.eup %3845 }
0x1a22   :  { %v1820_v55 = vadd.f32 1.0, %v3846_v54 }
0x1a24   :  { %3847 = vrcp.f32 %v1820_v55  ;;  %v2261_v55 = vld [vmem:[#allocation2 + $0xc] sm:$0x3] }
0x1a2e   :  { %v3848_v56 = vpop.eup %3847 }
0x1a2f   :  { %v1824_v59 = vmul.f32 %v3848_v56, %v4362_v18 }
0x1a92   :  { %v1827_v57 = vpop.permute.xlu0 %1826 }
0x1a93   :  { %v1829_v58 = vmul.f32 %v3848_v56, %v1827_v57 }
0x1a95   :  { %1831 = vrot.lane.b32.xlu1 %v1829_v58, %s4004_s2 }
0x1b07   :  { %v1832_v60 = vpop.permute.xlu1 %1831 }
0x1b08   :  { %v4409_v61 = vadd.f32 %v1832_v60, %v1824_v59 }
0x1b0a   :  { %3849 = vtanh.f32 %v4409_v61 }
0x1b14   :  { %v3850_v62 = vpop.eup %3849 }
0x1b15   :  { %1837 = vrot.lane.b32.xlu0 %v3850_v62, %s4003_s13 }
0x1b87   :  { %v1838_v63 = vpop.permute.xlu0 %1837 }
0x1b88   :  { %v1840_v2 = vmul.f32 %v3848_v56, %v1838_v63 }
0x1b8a   :  { %1842 = vrot.lane.b32.xlu1 %v1840_v2, %s4004_s2 }
0x1bfc   :  { %v1843_v4 = vpop.permute.xlu1 %1842 }
0x1bfd   :  { %3405 = vmatmul.mubr.msk.f32.vlgmr.msra.gmra.mrb[18].mxu1 %vm188_vm2, %v1843_v4 }
0x1bfe   :  { %3665 = vmatpush3.bf16.msra.mxu1 %v4119_v8  ;;  %3415 = vmatprep.mubr.msk.f32.mxu1 %vm4001_vm0, %v4002_v1 }
0x1bff   :  { %3666 = vmatprep.subr.bf16.mxu1 %v4000_v0 }
0x1c02   :  { %3668 = vmatpush3.bf16.msra.mxu1 %v4128_v12 }
0x1c03   :  { %3681 = vmatprep.subr.bf16.mxu1 %v4000_v0 }
0x1c05   :  { %3416 = vmatmul.mubr.msk.f32.vlgmr.msra.gmra.mrb[20].mxu1 %vm188_vm2, %v1673_v46 }
0x1c06   :  { %3683 = vmatpush3.bf16.msra.mxu1 %v4208_v3  ;;  %3448 = vmatprep.mubr.msk.f32.mxu1 %vm4001_vm0, %v4002_v1 }
0x1c07   :  { %3684 = vmatprep.subr.bf16.mxu1 %v4000_v0 }
0x1c0a   :  { %3686 = vmatpush3.bf16.msra.mxu1 %v4214_v5 }
0x1c0b   :  { %3687 = vmatprep.subr.bf16.mxu1 %v4000_v0 }
0x1cd0   :  { %v1912_v6 = vpop.f32.mrb[18].mxu1 }
0x1cd1   :  { %v1913_v7 = vadd.f32 %v4238_v11, %v1912_v6  ;;  %v3406_v9 = vpop.f32.mrb[19].mxu1 }
0x1cd3   :  { %1917 = vst.msk [vmem:[#allocation9 + $0x8] sm:$0x3] %vm544_vm3, %v1913_v7 }
0x1cd8   :  { %v1985_v13 = vpop.f32.mrb[20].mxu1 }
0x1cd9   :  { %v1989_v14 = vadd.f32 %v1985_v13, %v1918_v10  ;;  %v3417_v15 = vpop.f32.mrb[21].mxu1 }
0x1cdb   :  { %3851 = vtanh.f32 %v1989_v14  ;;  %v2999_v17 = vmul.f32 -1.442695, %v1989_v14 }
0x1cdd   :  { %3853 = vpow2.f32 %v2999_v17 }
0x1ce5   :  { %v3852_v16 = vpop.eup %3851 }
0x1ce6   :  { %1999 = vrot.lane.b32.xlu0 %v3852_v16, %s4003_s13 }
0x1ce7   :  { %v3854_v18 = vpop.eup %3853 }
0x1ce8   :  { %v1993_v19 = vadd.f32 1.0, %v3854_v18 }
0x1cea   :  { %3855 = vrcp.f32 %v1993_v19 }
0x1cf4   :  { %v3856_v20 = vpop.eup %3855 }
0x1cf5   :  { %v1997_v23 = vmul.f32 %v3856_v20, %v4386_v41 }
0x1d58   :  { %v2000_v21 = vpop.permute.xlu0 %1999 }
0x1d59   :  { %v2002_v22 = vmul.f32 %v3856_v20, %v2000_v21 }
0x1d5b   :  { %2004 = vrot.lane.b32.xlu1 %v2002_v22, %s4004_s2 }
0x1dcd   :  { %v2005_v24 = vpop.permute.xlu1 %2004 }
0x1dce   :  { %v4433_v25 = vadd.f32 %v2005_v24, %v1997_v23 }
0x1dd0   :  { %3857 = vtanh.f32 %v4433_v25 }
0x1dda   :  { %v3858_v26 = vpop.eup %3857 }
0x1ddb   :  { %2010 = vrot.lane.b32.xlu0 %v3858_v26, %s4003_s13 }
0x1e4d   :  { %v2011_v27 = vpop.permute.xlu0 %2010 }
0x1e4e   :  { %v2013_v28 = vmul.f32 %v3856_v20, %v2011_v27 }
0x1e50   :  { %2015 = vrot.lane.b32.xlu1 %v2013_v28, %s4004_s2 }
0x1ec2   :  { %v2016_v29 = vpop.permute.xlu1 %2015 }
0x1ec3   :  { %3427 = vmatmul.mubr.msk.f32.vlgmr.msra.gmra.mrb[12].mxu0 %vm188_vm2, %v2016_v29 }
0x1ec4   :  { %3677 = vmatpush3.bf16.msra.mxu0 %v4164_v43  ;;  %3437 = vmatprep.mubr.msk.f32.mxu0 %vm4001_vm0, %v4002_v1 }
0x1ec5   :  { %3678 = vmatprep.subr.bf16.mxu0 %v4000_v0 }
0x1ec8   :  { %3680 = vmatpush3.bf16.msra.mxu0 %v4174_v47 }
0x1ec9   :  { %3693 = vmatprep.subr.bf16.mxu0 %v4000_v0 }
0x1ecb   :  { %3438 = vmatmul.mubr.msk.f32.vlgmr.msra.gmra.mrb[12].mxu0 %vm188_vm2, %v1843_v4 }
0x1ecc   :  { %3695 = vmatpush3.bf16.msra.mxu0 %v4148_v35  ;;  %3470 = vmatprep.mubr.msk.f32.mxu0 %vm4001_vm0, %v4002_v1 }
0x1ecd   :  { %3696 = vmatprep.subr.bf16.mxu0 %v4000_v0 }
0x1ed0   :  { %3698 = vmatpush3.bf16.msra.mxu0 %v4151_v37 }
0x1ed1   :  { %3699 = vmatprep.subr.bf16.mxu0 %v4000_v0 }
0x1f9e   :  { %v2155_v30 = vpop.f32.mrb[12].mxu0 }
0x1f9f   :  { %v3740_v32 = vadd.f32 %v4191_v48, %v2155_v30  ;;  %v3439_v33 = vpop.f32.mrb[13].mxu0 }
0x1fa1   :  { %3859 = vtanh.f32 %v3740_v32  ;;  %v3002_v31 = vmul.f32 -1.442695, %v3740_v32 }
0x1fa3   :  { %3861 = vpow2.f32 %v3002_v31 }
0x1fab   :  { %v3860_v34 = vpop.eup %3859 }
0x1fac   :  { %2169 = vrot.lane.b32.xlu0 %v3860_v34, %s4003_s13 }
0x1fad   :  { %v3862_v36 = vpop.eup %3861 }
0x1fae   :  { %v2163_v38 = vadd.f32 1.0, %v3862_v36 }
0x1fb0   :  { %3863 = vrcp.f32 %v2163_v38 }
0x1fba   :  { %v3864_v39 = vpop.eup %3863 }
0x1fbb   :  { %v2167_v42 = vmul.f32 %v3864_v39, %v4409_v61 }
0x201e   :  { %v2170_v40 = vpop.permute.xlu0 %2169 }
0x201f   :  { %v2172_v41 = vmul.f32 %v3864_v39, %v2170_v40 }
0x2021   :  { %2174 = vrot.lane.b32.xlu1 %v2172_v41, %s4004_s2 }
0x2093   :  { %v2175_v44 = vpop.permute.xlu1 %2174 }
0x2094   :  { %v4456_v45 = vadd.f32 %v2175_v44, %v2167_v42 }
0x2096   :  { %3865 = vtanh.f32 %v4456_v45 }
0x20a0   :  { %v3866_v46 = vpop.eup %3865 }
0x20a1   :  { %2180 = vrot.lane.b32.xlu0 %v3866_v46, %s4003_s13 }
0x2113   :  { %v2181_v49 = vpop.permute.xlu0 %2180 }
0x2114   :  { %v2183_v50 = vmul.f32 %v3864_v39, %v2181_v49 }
0x2116   :  { %2185 = vrot.lane.b32.xlu1 %v2183_v50, %s4004_s2 }
0x2188   :  { %v2186_v51 = vpop.permute.xlu1 %2185 }
0x2189   :  { %3449 = vmatmul.mubr.msk.f32.vlgmr.msra.gmra.mrb[22].mxu1 %vm188_vm2, %v2186_v51 }
0x218a   :  { %3689 = vmatpush3.bf16.msra.mxu1 %v4119_v8  ;;  %3459 = vmatprep.mubr.msk.f32.mxu1 %vm4001_vm0, %v4002_v1 }
0x218b   :  { %3690 = vmatprep.subr.bf16.mxu1 %v4000_v0 }
0x218e   :  { %3692 = vmatpush3.bf16.msra.mxu1 %v4128_v12 }
0x218f   :  { %3705 = vmatprep.subr.bf16.mxu1 %v4000_v0 }
0x2191   :  { %3460 = vmatmul.mubr.msk.f32.vlgmr.msra.gmra.mrb[24].mxu1 %vm188_vm2, %v2016_v29 }
0x2192   :  { %3707 = vmatpush3.bf16.msra.mxu1 %v4208_v3  ;;  %3492 = vmatprep.mubr.msk.f32.mxu1 %vm4001_vm0, %v4002_v1 }
0x2193   :  { %3708 = vmatprep.subr.bf16.mxu1 %v4000_v0 }
0x2196   :  { %3710 = vmatpush3.bf16.msra.mxu1 %v4214_v5 }
0x2197   :  { %3711 = vmatprep.subr.bf16.mxu1 %v4000_v0 }
0x225c   :  { %v2255_v52 = vpop.f32.mrb[22].mxu1 }
0x225d   :  { %v2256_v53 = vadd.f32 %v4238_v11, %v2255_v52  ;;  %v3450_v54 = vpop.f32.mrb[23].mxu1  ;;  %v3899_v52 = vld [vmem:[%s4567_s5] ss:$0 sm:$0xff]  ;;  %s4005_s5 = smov [#allocation9]  }
0x225e   :  { %s2952_s29 = sshll.u32 %s4005_s5, 4  ;;  %s2953_s29 = int_to_ptr.vmem [resolvable:$true] %s2952_s29 }
0x225f   :  { %2260 = vst.msk [vmem:[#allocation9 + $0xa] sm:$0x3] %vm544_vm3, %v2256_v53  ;;  %s3967_s11 = scalar_lea.vmem %s2953_s29, 256  ;;  %p3972_p11 = scmp.lt.s32.totalorder %s2953_s29, %s2953_s29 }
0x2260   :  { %p3968_p10 = scmp.ne.s32.totalorder %s2953_s29, %s3967_s11  ;;  %p3973_p12 = scmp.lt.s32.totalorder %s3967_s11, %s3967_s11 }
0x2262   :  { %p3974_p13 = por %p3973_p12, %p3972_p11 }
0x2264   :  { %v2328_v56 = vpop.f32.mrb[24].mxu1  ;;  %p3975_p0 = pnand %p3974_p13, %p3968_p10 }
0x2265   :  { %v2332_v57 = vadd.f32 %v2328_v56, %v2261_v55  ;;  %v3461_v58 = vpop.f32.mrb[25].mxu1 }
0x2267   :  { %3867 = vtanh.f32 %v2332_v57  ;;  %v3005_v60 = vmul.f32 -1.442695, %v2332_v57 }
0x2269   :  { %3869 = vpow2.f32 %v3005_v60 }
0x2271   :  { %v3868_v59 = vpop.eup %3867 }
0x2272   :  { %2342 = vrot.lane.b32.xlu0 %v3868_v59, %s4003_s13 }
0x2273   :  { %v3870_v61 = vpop.eup %3869 }
0x2274   :  { %v2336_v62 = vadd.f32 1.0, %v3870_v61 }
0x2276   :  { %3871 = vrcp.f32 %v2336_v62 }
0x2280   :  { %v3872_v63 = vpop.eup %3871 }
0x2281   :  { %v2340_v6 = vmul.f32 %v3872_v63, %v4433_v25 }
0x22e4   :  { %v2343_v2 = vpop.permute.xlu0 %2342 }
0x22e5   :  { %v2345_v4 = vmul.f32 %v3872_v63, %v2343_v2 }
0x22e7   :  { %2347 = vrot.lane.b32.xlu1 %v2345_v4, %s4004_s2 }
0x2359   :  { %v2348_v7 = vpop.permute.xlu1 %2347 }
0x235a   :  { %v4480_v9 = vadd.f32 %v2348_v7, %v2340_v6  ;;  %v3900_v6 = vld [vmem:[%s4570_s8] ss:$0 sm:$0xff] }
0x235c   :  { %3873 = vtanh.f32 %v4480_v9 }
0x2366   :  { %v3874_v10 = vpop.eup %3873 }
0x2367   :  { %2353 = vrot.lane.b32.xlu0 %v3874_v10, %s4003_s13 }
0x23d9   :  { %v2354_v13 = vpop.permute.xlu0 %2353 }
0x23da   :  { %v2356_v14 = vmul.f32 %v3872_v63, %v2354_v13 }
0x23dc   :  { %2358 = vrot.lane.b32.xlu1 %v2356_v14, %s4004_s2 }
0x244e   :  { %v2359_v15 = vpop.permute.xlu1 %2358 }
0x244f   :  { %3471 = vmatmul.mubr.msk.f32.vlgmr.msra.gmra.mrb[14].mxu0 %vm188_vm2, %v2359_v15 }
0x2450   :  { %3701 = vmatpush3.bf16.msra.mxu0 %v4164_v43  ;;  %3481 = vmatprep.mubr.msk.f32.mxu0 %vm4001_vm0, %v4002_v1 }
0x2451   :  { %3702 = vmatprep.subr.bf16.mxu0 %v4000_v0 }
0x2454   :  { %3704 = vmatpush3.bf16.msra.mxu0 %v4174_v47 }
0x2455   :  { %3717 = vmatprep.subr.bf16.mxu0 %v4000_v0 }
0x2457   :  { %3482 = vmatmul.mubr.msk.f32.vlgmr.msra.gmra.mrb[14].mxu0 %vm188_vm2, %v2186_v51 }
0x2458   :  { %3719 = vmatpush3.bf16.msra.mxu0 %v4148_v35  ;;  %3514 = vmatprep.mubr.msk.f32.mxu0 %vm4001_vm0, %v4002_v1 }
0x2459   :  { %3720 = vmatprep.subr.bf16.mxu0 %v4000_v0 }
0x245c   :  { %3722 = vmatpush3.bf16.msra.mxu0 %v4151_v37 }
0x245d   :  { %3723 = vmatprep.subr.bf16.mxu0 %v4000_v0 }
0x252a   :  { %v2498_v16 = vpop.f32.mrb[14].mxu0 }
0x252b   :  { %v3741_v17 = vadd.f32 %v4191_v48, %v2498_v16  ;;  %v3483_v18 = vpop.f32.mrb[15].mxu0 }
0x252d   :  { %3875 = vtanh.f32 %v3741_v17  ;;  %v3008_v20 = vmul.f32 -1.442695, %v3741_v17 }
0x252f   :  { %3877 = vpow2.f32 %v3008_v20 }
0x2537   :  { %v3876_v19 = vpop.eup %3875 }
0x2538   :  { %2512 = vrot.lane.b32.xlu0 %v3876_v19, %s4003_s13 }
0x2539   :  { %v3878_v35 = vpop.eup %3877 }
0x253a   :  { %v2506_v21 = vadd.f32 1.0, %v3878_v35 }
0x253c   :  { %3879 = vrcp.f32 %v2506_v21 }
0x2546   :  { %v3880_v22 = vpop.eup %3879 }
0x2547   :  { %v2510_v37 = vmul.f32 %v3880_v22, %v4456_v45 }
0x25aa   :  { %v2513_v23 = vpop.permute.xlu0 %2512 }
0x25ab   :  { %v2515_v24 = vmul.f32 %v3880_v22, %v2513_v23 }
0x25ad   :  { %2517 = vrot.lane.b32.xlu1 %v2515_v24, %s4004_s2 }
0x261f   :  { %v2518_v25 = vpop.permute.xlu1 %2517 }
0x2620   :  { %v4503_v26 = vadd.f32 %v2518_v25, %v2510_v37 }
0x2622   :  { %3881 = vtanh.f32 %v4503_v26 }
0x262c   :  { %v3882_v48 = vpop.eup %3881 }
0x262d   :  { %2523 = vrot.lane.b32.xlu0 %v3882_v48, %s4003_s13 }
0x269f   :  { %v2524_v27 = vpop.permute.xlu0 %2523 }
0x26a0   :  { %v2526_v28 = vmul.f32 %v3880_v22, %v2524_v27 }
0x26a2   :  { %2528 = vrot.lane.b32.xlu1 %v2526_v28, %s4004_s2 }
0x2714   :  { %v2529_v29 = vpop.permute.xlu1 %2528 }
0x2715   :  { %3493 = vmatmul.mubr.msk.f32.vlgmr.msra.gmra.mrb[26].mxu1 %vm188_vm2, %v2529_v29 }
0x2716   :  { %3713 = vmatpush3.bf16.msra.mxu1 %v4119_v8  ;;  %3503 = vmatprep.mubr.msk.f32.mxu1 %vm4001_vm0, %v4002_v1 }
0x2717   :  { %3714 = vmatprep.subr.bf16.mxu1 %v4000_v0 }
0x271a   :  { %3716 = vmatpush3.bf16.msra.mxu1 %v4128_v12  ;;  %v2604_v12 = vld [vmem:[#allocation2 + $0xe] sm:$0x3] }
0x271b   :  { %3729 = vmatprep.subr.bf16.mxu1 %v4000_v0 }
0x271d   :  { %3504 = vmatmul.mubr.msk.f32.vlgmr.msra.gmra.mrb[28].mxu1 %vm188_vm2, %v2359_v15 }
0x271e   :  { %3731 = vmatpush3.bf16.msra.mxu1 %v4208_v3  ;;  %3536 = vmatprep.mubr.msk.f32.mxu1 %vm4001_vm0, %v4002_v1 }
0x271f   :  { %3732 = vmatprep.subr.bf16.mxu1 %v4000_v0 }
0x2722   :  { %3734 = vmatpush3.bf16.msra.mxu1 %v4214_v5 }
0x27e8   :  { %v2598_v8 = vpop.f32.mrb[26].mxu1 }
0x27e9   :  { %v2599_v30 = vadd.f32 %v4238_v11, %v2598_v8  ;;  %v3494_v32 = vpop.f32.mrb[27].mxu1 }
0x27eb   :  { %2603 = vst.msk [vmem:[#allocation9 + $0xc] sm:$0x3] %vm544_vm3, %v2599_v30 }
0x27f0   :  { %v2671_v33 = vpop.f32.mrb[28].mxu1 }
0x27f1   :  { %v2675_v34 = vadd.f32 %v2671_v33, %v2604_v12  ;;  %v3505_v31 = vpop.f32.mrb[29].mxu1 }
0x27f3   :  { %3883 = vtanh.f32 %v2675_v34  ;;  %v3011_v3 = vmul.f32 -1.442695, %v2675_v34 }
0x27f5   :  { %3885 = vpow2.f32 %v3011_v3 }
0x27fd   :  { %v3884_v36 = vpop.eup %3883 }
0x27fe   :  { %2685 = vrot.lane.b32.xlu0 %v3884_v36, %s4003_s13 }
0x27ff   :  { %v3886_v38 = vpop.eup %3885 }
0x2800   :  { %v2679_v39 = vadd.f32 1.0, %v3886_v38 }
0x2802   :  { %3887 = vrcp.f32 %v2679_v39 }
0x280c   :  { %v3888_v5 = vpop.eup %3887 }
0x280d   :  { %v2683_v11 = vmul.f32 %v3888_v5, %v4480_v9 }
0x2870   :  { %v2686_v40 = vpop.permute.xlu0 %2685 }
0x2871   :  { %v2688_v41 = vmul.f32 %v3888_v5, %v2686_v40 }
0x2873   :  { %2690 = vrot.lane.b32.xlu1 %v2688_v41, %s4004_s2 }
0x28e5   :  { %v2691_v42 = vpop.permute.xlu1 %2690 }
0x28e6   :  { %v2693_v44 = vadd.f32 %v2691_v42, %v2683_v11 }
0x28e8   :  { %3889 = vtanh.f32 %v2693_v44 }
0x28f2   :  { %v3890_v45 = vpop.eup %3889 }
0x28f3   :  { %2696 = vrot.lane.b32.xlu0 %v3890_v45, %s4003_s13 }
0x2965   :  { %v2697_v46 = vpop.permute.xlu0 %2696 }
0x2966   :  { %v2699_v49 = vmul.f32 %v3888_v5, %v2697_v46 }
0x2968   :  { %2701 = vrot.lane.b32.xlu1 %v2699_v49, %s4004_s2 }
0x29da   :  { %v2702_v50 = vpop.permute.xlu1 %2701 }
0x29db   :  { %3515 = vmatmul.mubr.msk.f32.vlgmr.msra.gmra.mrb[16].mxu0 %vm188_vm2, %v2702_v50 }
0x29dc   :  { %3725 = vmatpush3.bf16.msra.mxu0 %v4164_v43  ;;  %3525 = vmatprep.mubr.msk.f32.mxu0 %vm4001_vm0, %v4002_v1 }
0x29dd   :  { %3726 = vmatprep.subr.bf16.mxu0 %v4000_v0 }
0x29e0   :  { %3728 = vmatpush3.bf16.msra.mxu0 %v4174_v47 }
0x29e3   :  { %3526 = vmatmul.mubr.msk.f32.vlgmr.msra.gmra.mrb[16].mxu0 %vm188_vm2, %v2529_v29 }
0x2ab6   :  { %v2841_v51 = vpop.f32.mrb[16].mxu0 }
0x2ab7   :  { %v3742_v53 = vadd.f32 %v3899_v52, %v2841_v51  ;;  %v3527_v54 = vpop.f32.mrb[17].mxu0 }
0x2ab9   :  { %3891 = vtanh.f32 %v3742_v53  ;;  %v3014_v43 = vmul.f32 -1.442695, %v3742_v53 }
0x2abb   :  { %3893 = vpow2.f32 %v3014_v43 }
0x2ac3   :  { %v3892_v55 = vpop.eup %3891 }
0x2ac4   :  { %2855 = vrot.lane.b32.xlu0 %v3892_v55, %s4003_s13 }
0x2ac5   :  { %v3894_v1 = vpop.eup %3893 }
0x2ac6   :  { %v2849_v56 = vadd.f32 1.0, %v3894_v1 }
0x2ac8   :  { %3895 = vrcp.f32 %v2849_v56 }
0x2ad2   :  { %v3896_v0 = vpop.eup %3895 }
0x2ad3   :  { %v2853_v58 = vmul.f32 %v3896_v0, %v4503_v26 }
0x2b36   :  { %v2856_v47 = vpop.permute.xlu0 %2855 }
0x2b37   :  { %v2858_v57 = vmul.f32 %v3896_v0, %v2856_v47 }
0x2b39   :  { %2860 = vrot.lane.b32.xlu1 %v2858_v57, %s4004_s2 }
0x2bab   :  { %v2861_v59 = vpop.permute.xlu1 %2860 }
0x2bac   :  { %v2863_v60 = vadd.f32 %v2861_v59, %v2853_v58 }
0x2bae   :  { %3897 = vtanh.f32 %v2863_v60 }
0x2bb8   :  { %v3898_v61 = vpop.eup %3897 }
0x2bb9   :  { %2866 = vrot.lane.b32.xlu0 %v3898_v61, %s4003_s13 }
0x2c2b   :  { %v2867_v62 = vpop.permute.xlu0 %2866 }
0x2c2c   :  { %v2869_v63 = vmul.f32 %v3896_v0, %v2867_v62 }
0x2c2e   :  { %2871 = vrot.lane.b32.xlu1 %v2869_v63, %s4004_s2 }
0x2ca0   :  { %v2872_v2 = vpop.permute.xlu1 %2871 }
0x2ca1   :  { %3537 = vmatmul.mubr.msk.f32.vlgmr.msra.gmra.mrb[30].mxu1 %vm188_vm2, %v2872_v2 }
0x2d74   :  { %v2941_v4 = vpop.f32.mrb[30].mxu1 }
0x2d75   :  { %v2942_v7 = vadd.f32 %v3900_v6, %v2941_v4  ;;  %v3538_v9 = vpop.f32.mrb[31].mxu1 }
0x2d77   :  { %2946 = vst.msk [vmem:[#allocation9 + $0xe] sm:$0x3] %vm544_vm3, %v2942_v7 }
0x2d78   :  { %3978 = shalt.err (!%p3975_p0)
}
0x2d79   :  { %s3979_s10 = scalar_lea.hbm %s4571_s9, 256 }
0x2d7a   :  { %p3980_p1 = scmp.ne.s32.totalorder %s4571_s9, %s3979_s10  ;;  %p3983_p2 = scmp.lt.u32.totalorder %s3979_s10, %s4571_s9 }
0x2d7c   :  { %p3985_p3 = pnand %p3983_p2, %p3980_p1 }
0x2d7e   :  { %3988 = shalt.err (!%p3985_p3)
}
0x2d7f   :  { %s4006_s17 = smov 2  }
0x2d80   :  { %2958 = dma.vmem_to_hbm [thread:$0]  %s2953_s29, 256, %s4571_s9, [#allocation5], %s4004_s2, %s4004_s2, %s4006_s17  }
0x2d81   :  { %3993 = dma.done.wait [#allocation5], 256  }
0x2d82   :  { %3994 = vsyncadd [#allocation5], 4294967040 }
0x2d83   :  { %2962 = vsyncpa [#allocation4], 1 }
0x2d84   :  { %2963 = vsyncpa [#allocation7], 1 }
0x2d85   :  { %2964 = vsyncpa [#allocation5], 1 }

</bundles_post_ra>
